<compile_context>
chip_gen: v7x
topology: tpu7x:2x2x1
jax: 0.10.0
libtpu: 0.0.40
codegen_flags: <defaults>
</compile_context>

<pallas_src>
import functools

import jax
import jax.numpy as jnp
from jax.experimental import pallas as pl
from jax.experimental.pallas import tpu as pltpu

LANE = 128
BF16_SUBLANE = 16


def _round_up(n, m):
    return ((n + m - 1) // m) * m


def _pick_row_tile(n_pad):
    """Largest row tile (of 512/256/128) dividing the padded node count."""
    for tm in (512, 256, 128):
        if n_pad % tm == 0:
            return tm
    return n_pad


def _vmem_limit_bytes(per_step_bytes):
    """VMEM limit = actual footprint with headroom, clamped below physical capacity."""
    cap = 64 * 1024 * 1024                      # conservative default (v7x physical)
    try:
        cap = int(getattr(pltpu.get_tpu_info(), "vmem_capacity_bytes", cap))
    except Exception:
        pass
    want = max(2 * int(per_step_bytes) + (2 << 20), 16 << 20)
    return int(min(want, cap - (8 << 20)))


def _adj_row_spec(tm, n_pad, num_tiles):
    """Row-tile stream of the adjacency; 3-deep buffered when there is enough work."""
    if num_tiles >= 3:
        return pl.BlockSpec((tm, n_pad), lambda i: (i, 0),
                            pipeline_mode=pl.Buffered(3))
    return pl.BlockSpec((tm, n_pad), lambda i: (i, 0))


# --------------------------------------------------------------------------- #
# Kernels                                                                      #
# --------------------------------------------------------------------------- #
def _sage_conv_kernel(a_ref, invdeg_ref, hall_ref, hrow_ref,
                      wl_ref, wr_ref, b_ref, o_ref):
    """One SAGEConv (mean aggr) + ReLU for one tile of TM node rows.

    agg   = (A_counts[tile] @ h_all) * inv_deg[tile]     (exact 1/deg scale in f32)
    h_out = relu(agg @ Wl + h[tile] @ Wr + b)            (two-dot form, f32 acc)
    """
    agg = jnp.dot(a_ref[...], hall_ref[...], preferred_element_type=jnp.float32)
    agg = agg * invdeg_ref[...]                          # (TM, 1) f32 row scale (VPU)

    out = jnp.dot(agg.astype(jnp.bfloat16), wl_ref[...],
                  preferred_element_type=jnp.float32)
    out += jnp.dot(hrow_ref[...], wr_ref[...], preferred_element_type=jnp.float32)
    out += b_ref[...]
    o_ref[...] = jnp.maximum(out, 0.0).astype(o_ref.dtype)


def _sage_head_kernel(a_ref, invdeg_ref, hall_ref, hrow_ref,
                      w2l_ref, w2r_ref, b2_ref,
                      wl1_ref, bl1_ref, wl2_ref, bl2_ref, o_ref, *, num_classes):
    """conv2 + ReLU + lin1 + ReLU + (eval dropout) + lin2 + log_softmax, per row tile."""
    agg = jnp.dot(a_ref[...], hall_ref[...], preferred_element_type=jnp.float32)
    agg = agg * invdeg_ref[...]

    h2 = jnp.dot(agg.astype(jnp.bfloat16), w2l_ref[...],
                 preferred_element_type=jnp.float32)
    h2 += jnp.dot(hrow_ref[...], w2r_ref[...], preferred_element_type=jnp.float32)
    h2 = jnp.maximum(h2 + b2_ref[...], 0.0)

    # lin1 + ReLU (eval-mode dropout is the identity)
    z = jnp.dot(h2.astype(jnp.bfloat16), wl1_ref[...],
                preferred_element_type=jnp.float32) + bl1_ref[...]
    z = jnp.maximum(z, 0.0)

    # lin2
    logits = jnp.dot(z.astype(jnp.bfloat16), wl2_ref[...],
                     preferred_element_type=jnp.float32) + bl2_ref[...]

    # log_softmax over the valid class columns only (padded columns masked out)
    col = jax.lax.broadcasted_iota(jnp.int32, logits.shape, 1)
    masked = jnp.where(col < num_classes, logits, jnp.float32(-1e30))
    m = jnp.max(masked, axis=-1, keepdims=True)
    lse = m + jnp.log(jnp.sum(jnp.exp(masked - m), axis=-1, keepdims=True))
    o_ref[...] = (logits - lse).astype(o_ref.dtype)


# --------------------------------------------------------------------------- #
# pallas_call wrappers                                                         #
# --------------------------------------------------------------------------- #
def _sage_conv_call(adj, inv_deg, h, wl, wr, b, *, tm):
    n_pad = adj.shape[0]
    f_in = h.shape[1]
    f_out = wl.shape[1]
    nt = n_pad // tm
    nbuf_a = 3 if nt >= 3 else 2

    flops = int(2 * n_pad * n_pad * f_in + 4 * n_pad * f_in * f_out
                + 4 * n_pad * f_out)
    bytes_accessed = int(n_pad * n_pad * 2 + n_pad * f_in * 2 + n_pad * 4
                         + 4 * f_in * f_out + 4 * f_out + n_pad * f_out * 2)
    vmem_need = int(nbuf_a * tm * n_pad * 2            # A row tiles
                    + 2 * tm * 4                       # inv_deg tiles
                    + 2 * n_pad * f_in * 2             # resident h_all
                    + 2 * tm * f_in * 2                # h row tiles
                    + 2 * (4 * f_in * f_out + 4 * f_out)
                    + 2 * tm * f_out * 2               # output tiles
                    + 6 * tm * max(f_in, f_out) * 4)   # f32 intermediates

    return pl.pallas_call(
        _sage_conv_kernel,
        out_shape=jax.ShapeDtypeStruct((n_pad, f_out), jnp.bfloat16),
        grid_spec=pltpu.PrefetchScalarGridSpec(
            num_scalar_prefetch=0,
            grid=(nt,),
            in_specs=[
                _adj_row_spec(tm, n_pad, nt),
                pl.BlockSpec((tm, 1), lambda i: (i, 0)),
                pl.BlockSpec((n_pad, f_in), lambda i: (0, 0)),   # h_all, resident
                pl.BlockSpec((tm, f_in), lambda i: (i, 0)),      # h row tile
                pl.BlockSpec((f_in, f_out), lambda i: (0, 0)),
                pl.BlockSpec((f_in, f_out), lambda i: (0, 0)),
                pl.BlockSpec((1, f_out), lambda i: (0, 0)),
            ],
            out_specs=pl.BlockSpec((tm, f_out), lambda i: (i, 0))),
        compiler_params=pltpu.CompilerParams(
            dimension_semantics=("parallel",),
            vmem_limit_bytes=_vmem_limit_bytes(vmem_need)),
        cost_estimate=pl.CostEstimate(flops=flops, transcendentals=0,
                                      bytes_accessed=bytes_accessed),
    )(adj, inv_deg, h, h, wl, wr, b)


def _sage_head_call(adj, inv_deg, h, w2l, w2r, b2, wl1, bl1, wl2, bl2, *,
                    tm, num_classes):
    n_pad = adj.shape[0]
    h_pad = h.shape[1]
    o_pad = wl2.shape[1]
    nt = n_pad // tm
    nbuf_a = 3 if nt >= 3 else 2

    flops = int(2 * n_pad * n_pad * h_pad
                + 6 * n_pad * h_pad * h_pad
                + 2 * n_pad * h_pad * o_pad
                + 12 * n_pad * h_pad)
    transcendentals = int(n_pad * o_pad)
    bytes_accessed = int(n_pad * n_pad * 2 + n_pad * h_pad * 2 + n_pad * 4
                         + 2 * (3 * h_pad * h_pad + h_pad * o_pad)
                         + 4 * (3 * h_pad + o_pad)
                         + n_pad * o_pad * 4)
    vmem_need = int(nbuf_a * tm * n_pad * 2
                    + 2 * tm * 4
                    + 2 * n_pad * h_pad * 2
                    + 2 * tm * h_pad * 2
                    + 2 * (2 * (3 * h_pad * h_pad + h_pad * o_pad)
                           + 4 * (3 * h_pad + o_pad))
                    + 2 * tm * o_pad * 4
                    + 8 * tm * h_pad * 4)

    return pl.pallas_call(
        functools.partial(_sage_head_kernel, num_classes=num_classes),
        out_shape=jax.ShapeDtypeStruct((n_pad, o_pad), jnp.float32),
        grid_spec=pltpu.PrefetchScalarGridSpec(
            num_scalar_prefetch=0,
            grid=(nt,),
            in_specs=[
                _adj_row_spec(tm, n_pad, nt),
                pl.BlockSpec((tm, 1), lambda i: (i, 0)),
                pl.BlockSpec((n_pad, h_pad), lambda i: (0, 0)),  # h_all, resident
                pl.BlockSpec((tm, h_pad), lambda i: (i, 0)),     # h row tile
                pl.BlockSpec((h_pad, h_pad), lambda i: (0, 0)),
                pl.BlockSpec((h_pad, h_pad), lambda i: (0, 0)),
                pl.BlockSpec((1, h_pad), lambda i: (0, 0)),
                pl.BlockSpec((h_pad, h_pad), lambda i: (0, 0)),
                pl.BlockSpec((1, h_pad), lambda i: (0, 0)),
                pl.BlockSpec((h_pad, o_pad), lambda i: (0, 0)),
                pl.BlockSpec((1, o_pad), lambda i: (0, 0)),
            ],
            out_specs=pl.BlockSpec((tm, o_pad), lambda i: (i, 0))),
        compiler_params=pltpu.CompilerParams(
            dimension_semantics=("parallel",),
            vmem_limit_bytes=_vmem_limit_bytes(vmem_need)),
        cost_estimate=pl.CostEstimate(flops=flops, transcendentals=transcendentals,
                                      bytes_accessed=bytes_accessed),
    )(adj, inv_deg, h, h, w2l, w2r, b2, wl1, bl1, wl2, bl2)


def graphsage_forward(adj_counts, inv_deg, x, params, num_classes):
    """Full forward. adj_counts: (Np, Np) bf16 edge counts; inv_deg: (Np, 1) f32."""
    (w1l, w1r, b1, w2l, w2r, b2, wl1, bl1, wl2, bl2) = params
    n = x.shape[0]
    n_pad = adj_counts.shape[0]
    c_pad = w1l.shape[0]
    tm = _pick_row_tile(n_pad)

    x_pad = jnp.pad(x, ((0, n_pad - n), (0, c_pad - x.shape[1]))).astype(jnp.bfloat16)

    h1 = _sage_conv_call(adj_counts, inv_deg, x_pad, w1l, w1r, b1, tm=tm)
    out_pad = _sage_head_call(adj_counts, inv_deg, h1, w2l, w2r, b2,
                              wl1, bl1, wl2, bl2, tm=tm, num_classes=num_classes)
    return out_pad[:n, :num_classes]


# --------------------------------------------------------------------------- #
# Graph preprocessing (built once per graph, outside the forward)              #
# --------------------------------------------------------------------------- #
def build_adjacency(edge_index, num_nodes, n_pad):
    """Returns (counts bf16 (Np,Np), inv_deg f32 (Np,1)).

    counts[i, j] = #edges j -> i (exact in bf16 up to 256 multi-edges); the exact
    f32 1/deg mean-normalization is applied inside the kernel after the matmul.
    """
    src, dst = edge_index[0], edge_index[1]
    counts = jnp.zeros((num_nodes, num_nodes), jnp.float32).at[dst, src].add(1.0)
    deg = counts.sum(axis=1, keepdims=True)
    inv_deg = jnp.where(deg > 0, 1.0 / jnp.maximum(deg, 1.0), 0.0)
    counts = jnp.pad(counts, ((0, n_pad - num_nodes), (0, n_pad - num_nodes)))
    inv_deg = jnp.pad(inv_deg, ((0, n_pad - num_nodes), (0, 0)))
    return counts.astype(jnp.bfloat16), inv_deg.astype(jnp.float32)


# --------------------------------------------------------------------------- #
# Parameters                                                                   #
# --------------------------------------------------------------------------- #
def glorot(key, fan_in, fan_out):
    limit = jnp.sqrt(6.0 / (fan_in + fan_out))
    return jax.random.uniform(key, (fan_in, fan_out), jnp.float32, -limit, limit)


def init_params(key, input_channels, hidden_channels, output_channels):
    ks = jax.random.split(key, 10)
    return dict(
        conv1_wl=glorot(ks[0], input_channels, hidden_channels),
        conv1_wr=glorot(ks[1], input_channels, hidden_channels),
        conv1_b=0.1 * jax.random.normal(ks[2], (hidden_channels,), jnp.float32),
        conv2_wl=glorot(ks[3], hidden_channels, hidden_channels),
        conv2_wr=glorot(ks[4], hidden_channels, hidden_channels),
        conv2_b=0.1 * jax.random.normal(ks[5], (hidden_channels,), jnp.float32),
        lin1_w=glorot(ks[6], hidden_channels, hidden_channels),
        lin1_b=0.1 * jax.random.normal(ks[7], (hidden_channels,), jnp.float32),
        lin2_w=glorot(ks[8], hidden_channels, output_channels),
        lin2_b=0.1 * jax.random.normal(ks[9], (output_channels,), jnp.float32),
    )


def _pad2(w, rows, cols):
    return jnp.pad(w, ((0, rows - w.shape[0]), (0, cols - w.shape[1])))


def pack_params(p, c_pad, h_pad, o_pad):
    """Zero-pad to kernel dims (K dims to sublane multiples, lane dims to 128); bf16 weights, f32 biases."""
    return (
        _pad2(p["conv1_wl"], c_pad, h_pad).astype(jnp.bfloat16),
        _pad2(p["conv1_wr"], c_pad, h_pad).astype(jnp.bfloat16),
        _pad2(p["conv1_b"][None, :], 1, h_pad),
        _pad2(p["conv2_wl"], h_pad, h_pad).astype(jnp.bfloat16),
        _pad2(p["conv2_wr"], h_pad, h_pad).astype(jnp.bfloat16),
        _pad2(p["conv2_b"][None, :], 1, h_pad),
        _pad2(p["lin1_w"], h_pad, h_pad).astype(jnp.bfloat16),
        _pad2(p["lin1_b"][None, :], 1, h_pad),
        _pad2(p["lin2_w"], h_pad, o_pad).astype(jnp.bfloat16),
        _pad2(p["lin2_b"][None, :], 1, o_pad),
    )


# --------------------------------------------------------------------------- #
# Pure-JAX f32 reference (for correctness check)                               #
# --------------------------------------------------------------------------- #
def reference_forward(x, edge_index, p, num_nodes):
    src, dst = edge_index[0], edge_index[1]
    counts = jnp.zeros((num_nodes, num_nodes), jnp.float32).at[dst, src].add(1.0)
    deg = counts.sum(axis=1, keepdims=True)
    adj = jnp.where(deg > 0, counts / jnp.maximum(deg, 1.0), 0.0)

    def sage(h, wl, wr, b):
        return jax.nn.relu((adj @ h) @ wl + h @ wr + b)

    h = sage(x, p["conv1_wl"], p["conv1_wr"], p["conv1_b"])
    h = sage(h, p["conv2_wl"], p["conv2_wr"], p["conv2_b"])
    z = jax.nn.relu(h @ p["lin1_w"] + p["lin1_b"])
    logits = z @ p["lin2_w"] + p["lin2_b"]
    return jax.nn.log_softmax(logits, axis=-1)


if __name__ == "__main__":
    key = jax.random.PRNGKey(0)
    k_x, k_e, k_p = jax.random.split(key, 3)

    num_nodes = 64
    input_channels = 16
    hidden_channels = 32
    output_channels = 8           # number of classes
    num_edges = 256

    n_pad = _round_up(num_nodes, LANE)
    c_pad = _round_up(input_channels, BF16_SUBLANE)   # contraction dim: sublane only
    h_pad = _round_up(hidden_channels, LANE)
    o_pad = _round_up(output_channels, LANE)

    x = jax.random.normal(k_x, (num_nodes, input_channels), jnp.float32)
    edge_index = jax.random.randint(k_e, (2, num_edges), 0, num_nodes, jnp.int32)

    raw_params = init_params(k_p, input_channels, hidden_channels, output_channels)
    kernel_params = pack_params(raw_params, c_pad, h_pad, o_pad)

    # Graph preprocessing hoisted out of the forward (cache per graph).
    adj_counts, inv_deg = build_adjacency(edge_index, num_nodes, n_pad)

    fwd = jax.jit(lambda a, d, xx, p: graphsage_forward(a, d, xx, p, output_channels))
    out = jax.block_until_ready(fwd(adj_counts, inv_deg, x, kernel_params))

    assert out.shape == (num_nodes, output_channels)
    assert bool(jnp.all(jnp.isfinite(out)))
    # log_softmax rows must normalize (computed in f32 inside the kernel)
    assert bool(jnp.allclose(jnp.exp(out).sum(axis=-1), 1.0, atol=1e-3))
    # compare against pure-JAX f32 reference (bf16 matmul inputs -> loose tol)
    ref = reference_forward(x, edge_index, raw_params, num_nodes)
    max_err = float(jnp.max(jnp.abs(out - ref)))
    assert max_err < 0.25, f"max abs error vs f32 reference too large: {max_err}"
    print("KERNEL_OK")
</pallas_src>

<mosaic_0001>
module attributes {stable_mosaic.version = 11 : i64} {
  func.func @_sage_conv_kernel(%arg0: i32, %arg1: memref<128x128xbf16, #tpu.memory_space<vmem>>, %arg2: memref<128x1xf32, #tpu.memory_space<vmem>>, %arg3: memref<128x16xbf16, #tpu.memory_space<vmem>>, %arg4: memref<128x16xbf16, #tpu.memory_space<vmem>>, %arg5: memref<16x128xbf16, #tpu.memory_space<vmem>>, %arg6: memref<16x128xbf16, #tpu.memory_space<vmem>>, %arg7: memref<1x128xf32, #tpu.memory_space<vmem>>, %arg8: memref<128x128xbf16, #tpu.memory_space<vmem>>) attributes {dimension_semantics = [#tpu.dimension_semantics<parallel>], iteration_bounds = array<i64: 1>, scalar_prefetch = 0 : i64, scratch_operands = 0 : i64, tpu.core_type = #tpu.core_type<tc>, window_params = [{transform_indices = @transform_0, window_bounds = array<i64: 128, 128>}, {transform_indices = @transform_1, window_bounds = array<i64: 128, 1>}, {pipeline_mode = #tpu.pipeline_mode<synchronous>, transform_indices = @transform_2, window_bounds = array<i64: 128, 16>}, {transform_indices = @transform_3, window_bounds = array<i64: 128, 16>}, {pipeline_mode = #tpu.pipeline_mode<synchronous>, transform_indices = @transform_4, window_bounds = array<i64: 16, 128>}, {pipeline_mode = #tpu.pipeline_mode<synchronous>, transform_indices = @transform_5, window_bounds = array<i64: 16, 128>}, {pipeline_mode = #tpu.pipeline_mode<synchronous>, transform_indices = @transform_6, window_bounds = array<i64: 1, 128>}, {transform_indices = @transform_7, window_bounds = array<i64: 128, 128>}]} {
    %c0 = arith.constant 0 : index
    %c0_0 = arith.constant 0 : index
    %0 = vector.load %arg1[%c0, %c0_0] : memref<128x128xbf16, #tpu.memory_space<vmem>>, vector<128x128xbf16>
    %c0_1 = arith.constant 0 : index
    %c0_2 = arith.constant 0 : index
    %1 = vector.load %arg3[%c0_1, %c0_2] : memref<128x16xbf16, #tpu.memory_space<vmem>>, vector<128x16xbf16>
    %cst = arith.constant dense<0.000000e+00> : vector<128x16xf32>
    %2 = tpu.matmul %0, %1, %cst {dimension_numbers = #tpu.dot_dimension_numbers<[1], [0], [0], [1], [0, 0, 1, 1], [], []>} : vector<128x128xbf16>, vector<128x16xbf16>, vector<128x16xf32> -> vector<128x16xf32>
    %c0_3 = arith.constant 0 : index
    %c0_4 = arith.constant 0 : index
    %3 = vector.load %arg2[%c0_3, %c0_4] : memref<128x1xf32, #tpu.memory_space<vmem>>, vector<128x1xf32>
    %4 = vector.broadcast %3 : vector<128x1xf32> to vector<128x16xf32>
    %5 = arith.mulf %2, %4 : vector<128x16xf32>
    %6 = arith.truncf %5 : vector<128x16xf32> to vector<128x16xbf16>
    %c0_5 = arith.constant 0 : index
    %c0_6 = arith.constant 0 : index
    %7 = vector.load %arg5[%c0_5, %c0_6] : memref<16x128xbf16, #tpu.memory_space<vmem>>, vector<16x128xbf16>
    %cst_7 = arith.constant dense<0.000000e+00> : vector<128x128xf32>
    %8 = tpu.matmul %6, %7, %cst_7 {dimension_numbers = #tpu.dot_dimension_numbers<[1], [0], [0], [1], [0, 0, 1, 1], [], []>} : vector<128x16xbf16>, vector<16x128xbf16>, vector<128x128xf32> -> vector<128x128xf32>
    %c0_8 = arith.constant 0 : index
    %c0_9 = arith.constant 0 : index
    %9 = vector.load %arg4[%c0_8, %c0_9] : memref<128x16xbf16, #tpu.memory_space<vmem>>, vector<128x16xbf16>
    %c0_10 = arith.constant 0 : index
    %c0_11 = arith.constant 0 : index
    %10 = vector.load %arg6[%c0_10, %c0_11] : memref<16x128xbf16, #tpu.memory_space<vmem>>, vector<16x128xbf16>
    %cst_12 = arith.constant dense<0.000000e+00> : vector<128x128xf32>
    %11 = tpu.matmul %9, %10, %cst_12 {dimension_numbers = #tpu.dot_dimension_numbers<[1], [0], [0], [1], [0, 0, 1, 1], [], []>} : vector<128x16xbf16>, vector<16x128xbf16>, vector<128x128xf32> -> vector<128x128xf32>
    %12 = arith.addf %8, %11 : vector<128x128xf32>
    %c0_13 = arith.constant 0 : index
    %c0_14 = arith.constant 0 : index
    %13 = vector.load %arg7[%c0_13, %c0_14] : memref<1x128xf32, #tpu.memory_space<vmem>>, vector<1x128xf32>
    %14 = vector.broadcast %13 : vector<1x128xf32> to vector<128x128xf32>
    %15 = arith.addf %12, %14 : vector<128x128xf32>
    %cst_15 = arith.constant 0.000000e+00 : f32
    %16 = vector.broadcast %cst_15 : f32 to vector<128x128xf32>
    %17 = arith.maximumf %15, %16 : vector<128x128xf32>
    %18 = arith.truncf %17 : vector<128x128xf32> to vector<128x128xbf16>
    %c0_16 = arith.constant 0 : index
    %c0_17 = arith.constant 0 : index
    %19 = vector.load %arg8[%c0_16, %c0_17] : memref<128x128xbf16, #tpu.memory_space<vmem>>, vector<128x128xbf16>
    tpu.vector_store %arg8[%c0_16, %c0_17], %18 {strides = array<i32>} : memref<128x128xbf16, #tpu.memory_space<vmem>>, vector<128x128xbf16>,
    return
  }
  func.func @transform_0(%arg0: i32) -> (i32, i32) {
    %c0_i32 = arith.constant 0 : i32
    %c0_i32_0 = arith.constant 0 : i32
    return %arg0, %c0_i32 : i32, i32
  }
  func.func @transform_1(%arg0: i32) -> (i32, i32) {
    %c0_i32 = arith.constant 0 : i32
    %c0_i32_0 = arith.constant 0 : i32
    return %arg0, %c0_i32 : i32, i32
  }
  func.func @transform_2(%arg0: i32) -> (i32, i32) {
    %c0_i32 = arith.constant 0 : i32
    %c0_i32_0 = arith.constant 0 : i32
    %c0_i32_1 = arith.constant 0 : i32
    return %c0_i32, %c0_i32_0 : i32, i32
  }
  func.func @transform_3(%arg0: i32) -> (i32, i32) {
    %c0_i32 = arith.constant 0 : i32
    %c0_i32_0 = arith.constant 0 : i32
    return %arg0, %c0_i32 : i32, i32
  }
  func.func @transform_4(%arg0: i32) -> (i32, i32) {
    %c0_i32 = arith.constant 0 : i32
    %c0_i32_0 = arith.constant 0 : i32
    %c0_i32_1 = arith.constant 0 : i32
    return %c0_i32, %c0_i32_0 : i32, i32
  }
  func.func @transform_5(%arg0: i32) -> (i32, i32) {
    %c0_i32 = arith.constant 0 : i32
    %c0_i32_0 = arith.constant 0 : i32
    %c0_i32_1 = arith.constant 0 : i32
    return %c0_i32, %c0_i32_0 : i32, i32
  }
  func.func @transform_6(%arg0: i32) -> (i32, i32) {
    %c0_i32 = arith.constant 0 : i32
    %c0_i32_0 = arith.constant 0 : i32
    %c0_i32_1 = arith.constant 0 : i32
    return %c0_i32, %c0_i32_0 : i32, i32
  }
  func.func @transform_7(%arg0: i32) -> (i32, i32) {
    %c0_i32 = arith.constant 0 : i32
    %c0_i32_0 = arith.constant 0 : i32
    return %arg0, %c0_i32 : i32, i32
  }
}

module attributes {stable_mosaic.version = 11 : i64} {
  func.func @_sage_head_kernel(%arg0: i32, %arg1: memref<128x128xbf16, #tpu.memory_space<vmem>>, %arg2: memref<128x1xf32, #tpu.memory_space<vmem>>, %arg3: memref<128x128xbf16, #tpu.memory_space<vmem>>, %arg4: memref<128x128xbf16, #tpu.memory_space<vmem>>, %arg5: memref<128x128xbf16, #tpu.memory_space<vmem>>, %arg6: memref<128x128xbf16, #tpu.memory_space<vmem>>, %arg7: memref<1x128xf32, #tpu.memory_space<vmem>>, %arg8: memref<128x128xbf16, #tpu.memory_space<vmem>>, %arg9: memref<1x128xf32, #tpu.memory_space<vmem>>, %arg10: memref<128x128xbf16, #tpu.memory_space<vmem>>, %arg11: memref<1x128xf32, #tpu.memory_space<vmem>>, %arg12: memref<128x128xf32, #tpu.memory_space<vmem>>) attributes {dimension_semantics = [#tpu.dimension_semantics<parallel>], iteration_bounds = array<i64: 1>, scalar_prefetch = 0 : i64, scratch_operands = 0 : i64, tpu.core_type = #tpu.core_type<tc>, window_params = [{transform_indices = @transform_0, window_bounds = array<i64: 128, 128>}, {transform_indices = @transform_1, window_bounds = array<i64: 128, 1>}, {pipeline_mode = #tpu.pipeline_mode<synchronous>, transform_indices = @transform_2, window_bounds = array<i64: 128, 128>}, {transform_indices = @transform_3, window_bounds = array<i64: 128, 128>}, {pipeline_mode = #tpu.pipeline_mode<synchronous>, transform_indices = @transform_4, window_bounds = array<i64: 128, 128>}, {pipeline_mode = #tpu.pipeline_mode<synchronous>, transform_indices = @transform_5, window_bounds = array<i64: 128, 128>}, {pipeline_mode = #tpu.pipeline_mode<synchronous>, transform_indices = @transform_6, window_bounds = array<i64: 1, 128>}, {pipeline_mode = #tpu.pipeline_mode<synchronous>, transform_indices = @transform_7, window_bounds = array<i64: 128, 128>}, {pipeline_mode = #tpu.pipeline_mode<synchronous>, transform_indices = @transform_8, window_bounds = array<i64: 1, 128>}, {pipeline_mode = #tpu.pipeline_mode<synchronous>, transform_indices = @transform_9, window_bounds = array<i64: 128, 128>}, {pipeline_mode = #tpu.pipeline_mode<synchronous>, transform_indices = @transform_10, window_bounds = array<i64: 1, 128>}, {transform_indices = @transform_11, window_bounds = array<i64: 128, 128>}]} {
    %c0 = arith.constant 0 : index
    %c0_0 = arith.constant 0 : index
    %0 = vector.load %arg1[%c0, %c0_0] : memref<128x128xbf16, #tpu.memory_space<vmem>>, vector<128x128xbf16>
    %c0_1 = arith.constant 0 : index
    %c0_2 = arith.constant 0 : index
    %1 = vector.load %arg3[%c0_1, %c0_2] : memref<128x128xbf16, #tpu.memory_space<vmem>>, vector<128x128xbf16>
    %cst = arith.constant dense<0.000000e+00> : vector<128x128xf32>
    %2 = tpu.matmul %0, %1, %cst {dimension_numbers = #tpu.dot_dimension_numbers<[1], [0], [0], [1], [0, 0, 1, 1], [], []>} : vector<128x128xbf16>, vector<128x128xbf16>, vector<128x128xf32> -> vector<128x128xf32>
    %c0_3 = arith.constant 0 : index
    %c0_4 = arith.constant 0 : index
    %3 = vector.load %arg2[%c0_3, %c0_4] : memref<128x1xf32, #tpu.memory_space<vmem>>, vector<128x1xf32>
    %4 = vector.broadcast %3 : vector<128x1xf32> to vector<128x128xf32>
    %5 = arith.mulf %2, %4 : vector<128x128xf32>
    %6 = arith.truncf %5 : vector<128x128xf32> to vector<128x128xbf16>
    %c0_5 = arith.constant 0 : index
    %c0_6 = arith.constant 0 : index
    %7 = vector.load %arg5[%c0_5, %c0_6] : memref<128x128xbf16, #tpu.memory_space<vmem>>, vector<128x128xbf16>
    %cst_7 = arith.constant dense<0.000000e+00> : vector<128x128xf32>
    %8 = tpu.matmul %6, %7, %cst_7 {dimension_numbers = #tpu.dot_dimension_numbers<[1], [0], [0], [1], [0, 0, 1, 1], [], []>} : vector<128x128xbf16>, vector<128x128xbf16>, vector<128x128xf32> -> vector<128x128xf32>
    %c0_8 = arith.constant 0 : index
    %c0_9 = arith.constant 0 : index
    %9 = vector.load %arg4[%c0_8, %c0_9] : memref<128x128xbf16, #tpu.memory_space<vmem>>, vector<128x128xbf16>
    %c0_10 = arith.constant 0 : index
    %c0_11 = arith.constant 0 : index
    %10 = vector.load %arg6[%c0_10, %c0_11] : memref<128x128xbf16, #tpu.memory_space<vmem>>, vector<128x128xbf16>
    %cst_12 = arith.constant dense<0.000000e+00> : vector<128x128xf32>
    %11 = tpu.matmul %9, %10, %cst_12 {dimension_numbers = #tpu.dot_dimension_numbers<[1], [0], [0], [1], [0, 0, 1, 1], [], []>} : vector<128x128xbf16>, vector<128x128xbf16>, vector<128x128xf32> -> vector<128x128xf32>
    %12 = arith.addf %8, %11 : vector<128x128xf32>
    %c0_13 = arith.constant 0 : index
    %c0_14 = arith.constant 0 : index
    %13 = vector.load %arg7[%c0_13, %c0_14] : memref<1x128xf32, #tpu.memory_space<vmem>>, vector<1x128xf32>
    %14 = vector.broadcast %13 : vector<1x128xf32> to vector<128x128xf32>
    %15 = arith.addf %12, %14 : vector<128x128xf32>
    %cst_15 = arith.constant 0.000000e+00 : f32
    %16 = vector.broadcast %cst_15 : f32 to vector<128x128xf32>
    %17 = arith.maximumf %15, %16 : vector<128x128xf32>
    %18 = arith.truncf %17 : vector<128x128xf32> to vector<128x128xbf16>
    %c0_16 = arith.constant 0 : index
    %c0_17 = arith.constant 0 : index
    %19 = vector.load %arg8[%c0_16, %c0_17] : memref<128x128xbf16, #tpu.memory_space<vmem>>, vector<128x128xbf16>
    %cst_18 = arith.constant dense<0.000000e+00> : vector<128x128xf32>
    %20 = tpu.matmul %18, %19, %cst_18 {dimension_numbers = #tpu.dot_dimension_numbers<[1], [0], [0], [1], [0, 0, 1, 1], [], []>} : vector<128x128xbf16>, vector<128x128xbf16>, vector<128x128xf32> -> vector<128x128xf32>
    %c0_19 = arith.constant 0 : index
    %c0_20 = arith.constant 0 : index
    %21 = vector.load %arg9[%c0_19, %c0_20] : memref<1x128xf32, #tpu.memory_space<vmem>>, vector<1x128xf32>
    %22 = vector.broadcast %21 : vector<1x128xf32> to vector<128x128xf32>
    %23 = arith.addf %20, %22 : vector<128x128xf32>
    %cst_21 = arith.constant 0.000000e+00 : f32
    %24 = vector.broadcast %cst_21 : f32 to vector<128x128xf32>
    %25 = arith.maximumf %23, %24 : vector<128x128xf32>
    %26 = arith.truncf %25 : vector<128x128xf32> to vector<128x128xbf16>
    %c0_22 = arith.constant 0 : index
    %c0_23 = arith.constant 0 : index
    %27 = vector.load %arg10[%c0_22, %c0_23] : memref<128x128xbf16, #tpu.memory_space<vmem>>, vector<128x128xbf16>
    %cst_24 = arith.constant dense<0.000000e+00> : vector<128x128xf32>
    %28 = tpu.matmul %26, %27, %cst_24 {dimension_numbers = #tpu.dot_dimension_numbers<[1], [0], [0], [1], [0, 0, 1, 1], [], []>} : vector<128x128xbf16>, vector<128x128xbf16>, vector<128x128xf32> -> vector<128x128xf32>
    %c0_25 = arith.constant 0 : index
    %c0_26 = arith.constant 0 : index
    %29 = vector.load %arg11[%c0_25, %c0_26] : memref<1x128xf32, #tpu.memory_space<vmem>>, vector<1x128xf32>
    %30 = vector.broadcast %29 : vector<1x128xf32> to vector<128x128xf32>
    %31 = arith.addf %28, %30 : vector<128x128xf32>
    %32 = tpu.iota {dimensions = array<i32: 1>} : vector<128x128xi32>
    %c8_i32 = arith.constant 8 : i32
    %33 = vector.broadcast %c8_i32 : i32 to vector<128x128xi32>
    %34 = arith.cmpi slt, %32, %33 : vector<128x128xi32>
    %cst_27 = arith.constant -1.000000e+30 : f32
    %35 = vector.broadcast %cst_27 : f32 to vector<128x128xf32>
    %36 = arith.select %34, %31, %35 : vector<128x128xi1>, vector<128x128xf32>
    %cst_28 = arith.constant dense<0xFF800000> : vector<128xf32>
    %37 = vector.multi_reduction <maximumf>, %36, %cst_28 [1] : vector<128x128xf32> to vector<128xf32>
    %38 = vector.shape_cast %37 : vector<128xf32> to vector<128x1xf32>
    %39 = vector.broadcast %38 : vector<128x1xf32> to vector<128x128xf32>
    %40 = arith.subf %36, %39 : vector<128x128xf32>
    %41 = math.exp %40 : vector<128x128xf32>
    %cst_29 = arith.constant dense<0.000000e+00> : vector<128xf32>
    %42 = vector.multi_reduction <add>, %41, %cst_29 [1] : vector<128x128xf32> to vector<128xf32>
    %43 = vector.shape_cast %42 : vector<128xf32> to vector<128x1xf32>
    %44 = math.log %43 : vector<128x1xf32>
    %45 = arith.addf %38, %44 : vector<128x1xf32>
    %46 = vector.broadcast %45 : vector<128x1xf32> to vector<128x128xf32>
    %47 = arith.subf %31, %46 : vector<128x128xf32>
    %c0_30 = arith.constant 0 : index
    %c0_31 = arith.constant 0 : index
    %48 = vector.load %arg12[%c0_30, %c0_31] : memref<128x128xf32, #tpu.memory_space<vmem>>, vector<128x128xf32>
    tpu.vector_store %arg12[%c0_30, %c0_31], %47 {strides = array<i32>} : memref<128x128xf32, #tpu.memory_space<vmem>>, vector<128x128xf32>,
    return
  }
  func.func @transform_0(%arg0: i32) -> (i32, i32) {
    %c0_i32 = arith.constant 0 : i32
    %c0_i32_0 = arith.constant 0 : i32
    return %arg0, %c0_i32 : i32, i32
  }
  func.func @transform_1(%arg0: i32) -> (i32, i32) {
    %c0_i32 = arith.constant 0 : i32
    %c0_i32_0 = arith.constant 0 : i32
    return %arg0, %c0_i32 : i32, i32
  }
  func.func @transform_2(%arg0: i32) -> (i32, i32) {
    %c0_i32 = arith.constant 0 : i32
    %c0_i32_0 = arith.constant 0 : i32
    %c0_i32_1 = arith.constant 0 : i32
    return %c0_i32, %c0_i32_0 : i32, i32
  }
  func.func @transform_3(%arg0: i32) -> (i32, i32) {
    %c0_i32 = arith.constant 0 : i32
    %c0_i32_0 = arith.constant 0 : i32
    return %arg0, %c0_i32 : i32, i32
  }
  func.func @transform_4(%arg0: i32) -> (i32, i32) {
    %c0_i32 = arith.constant 0 : i32
    %c0_i32_0 = arith.constant 0 : i32
    %c0_i32_1 = arith.constant 0 : i32
    return %c0_i32, %c0_i32_0 : i32, i32
  }
  func.func @transform_5(%arg0: i32) -> (i32, i32) {
    %c0_i32 = arith.constant 0 : i32
    %c0_i32_0 = arith.constant 0 : i32
    %c0_i32_1 = arith.constant 0 : i32
    return %c0_i32, %c0_i32_0 : i32, i32
  }
  func.func @transform_6(%arg0: i32) -> (i32, i32) {
    %c0_i32 = arith.constant 0 : i32
    %c0_i32_0 = arith.constant 0 : i32
    %c0_i32_1 = arith.constant 0 : i32
    return %c0_i32, %c0_i32_0 : i32, i32
  }
  func.func @transform_7(%arg0: i32) -> (i32, i32) {
    %c0_i32 = arith.constant 0 : i32
    %c0_i32_0 = arith.constant 0 : i32
    %c0_i32_1 = arith.constant 0 : i32
    return %c0_i32, %c0_i32_0 : i32, i32
  }
  func.func @transform_8(%arg0: i32) -> (i32, i32) {
    %c0_i32 = arith.constant 0 : i32
    %c0_i32_0 = arith.constant 0 : i32
    %c0_i32_1 = arith.constant 0 : i32
    return %c0_i32, %c0_i32_0 : i32, i32
  }
  func.func @transform_9(%arg0: i32) -> (i32, i32) {
    %c0_i32 = arith.constant 0 : i32
    %c0_i32_0 = arith.constant 0 : i32
    %c0_i32_1 = arith.constant 0 : i32
    return %c0_i32, %c0_i32_0 : i32, i32
  }
  func.func @transform_10(%arg0: i32) -> (i32, i32) {
    %c0_i32 = arith.constant 0 : i32
    %c0_i32_0 = arith.constant 0 : i32
    %c0_i32_1 = arith.constant 0 : i32
    return %c0_i32, %c0_i32_0 : i32, i32
  }
  func.func @transform_11(%arg0: i32) -> (i32, i32) {
    %c0_i32 = arith.constant 0 : i32
    %c0_i32_0 = arith.constant 0 : i32
    return %arg0, %c0_i32 : i32, i32
  }
}

</mosaic_0001>

<bundles_post_ra>
// kernel: _lambda_.2
= control target key start
LH: loop header
LB: loop body
LE: loop exit
PB: predicated region body
PF: predicated region fallthrough
CT: control target
= control target key end

     0   :  { %v1079_v1 = vmov 0   ;;  %vm438_vm0 = vcmask 130048   ;;  %s1289_s2 = inlined_call_operand.vmem [shape: bf16[128,16], index: 2, kind: input, shape index: {}, may-alias: {2,3}]   ;;  %s1290_s0 = inlined_call_operand.vmem [shape: bf16[128,128], index: 0, kind: input, shape index: {}]   ;;  %s1291_s1 = inlined_call_operand.vmem [shape: f32[128,1], index: 1, kind: input, shape index: {}]   ;;  %s1292_s5 = inlined_call_operand.vmem [shape: bf16[16,128], index: 5, kind: input, shape index: {}]   ;;  %s1293_s3 = inlined_call_operand.vmem [shape: bf16[128,16], index: 3, kind: input, shape index: {}, may-alias: {2,3}]   ;;  %s1294_s4 = inlined_call_operand.vmem [shape: bf16[16,128], index: 4, kind: input, shape index: {}]   ;;  %s1295_s6 = inlined_call_operand.vmem [shape: f32[1,128], index: 6, kind: input, shape index: {}]   ;;  %s1296_s7 = inlined_call_operand.vmem [shape: bf16[128,128], index: 7, kind: output, shape index: {}]  }
   0x1   :  { %v1053_v0 = vld [vmem:[%s1289_s2] sm:$0xff]   ;;  %1051 = vset.pattern.permute.xlu0 %v1079_v1  ;;  %1052 = vset.pattern.permute.xlu1 %v1079_v1  ;;  %v1054_v2 = vld [vmem:[%s1289_s2 + $0x8] sm:$0xff]   ;;  %v1055_v3 = vld [vmem:[%s1289_s2 + $0x10] sm:$0xff]  }
   0x2   :  { %966 = vmatprep.subr.bf16.mxu0 %v1053_v0  ;;  %v1056_v4 = vld [vmem:[%s1289_s2 + $0x18] sm:$0xff]   ;;  %v1061_v5 = vld [vmem:[%s1290_s0] sm:$0xff]   ;;  %v1058_v7 = vld [vmem:[%s1289_s2 + $0x28] sm:$0xff]  }
   0x3   :  { %967 = vmatpush3.bf16.msra.mxu0 %v1053_v0  ;;  %982 = vmatprep.mubr.bf16.mxu0 %v1061_v5  ;;  %v1057_v6 = vld [vmem:[%s1289_s2 + $0x20] sm:$0xff]   ;;  %v254_v9 = vld [vmem:[%s1291_s1 + $0x10] sm:$0xff]  ;;  %v253_v10 = vld [vmem:[%s1291_s1 + $0x8] sm:$0xff] }
   0x4   :  { %968 = vmatprep.subr.bf16.mxu0 %v1054_v2  ;;  %v252_v8 = vld [vmem:[%s1291_s1] sm:$0xff]  ;;  %280 = vperm.xlu1 %1052, %v254_v9   ;;  %v255_v11 = vld [vmem:[%s1291_s1 + $0x18] sm:$0xff]  ;;  %v1059_v12 = vld [vmem:[%s1289_s2 + $0x30] sm:$0xff]  }
   0x5   :  { %270 = vperm.xlu0 %1051, %v252_v8   ;;  %v256_v13 = vld [vmem:[%s1291_s1 + $0x20] sm:$0xff]  ;;  %v257_v14 = vld [vmem:[%s1291_s1 + $0x28] sm:$0xff]  ;;  %v1060_v15 = vld [vmem:[%s1289_s2 + $0x38] sm:$0xff]  }
   0x6   :  { %v1069_v16 = vld [vmem:[%s1292_s5] sm:$0xff]   ;;  %v258_v18 = vld [vmem:[%s1291_s1 + $0x30] sm:$0xff]  ;;  %v259_v19 = vld [vmem:[%s1291_s1 + $0x38] sm:$0xff] }
   0x7   :  { %969 = vmatpush3.bf16.msra.mxu0 %v1054_v2  ;;  %v1070_v17 = vld [vmem:[%s1293_s3] sm:$0xff]   ;;  %998 = vmatprep.subr.bf16.mxu1 %v1069_v16  ;;  %v1072_v21 = vld [vmem:[%s1293_s3 + $0x8] sm:$0xff]   ;;  %v1073_v22 = vld [vmem:[%s1293_s3 + $0x10] sm:$0xff]  }
   0x8   :  { %970 = vmatprep.subr.bf16.mxu0 %v1055_v3  ;;  %285 = vperm.xlu1 %1052, %v255_v11   ;;  %v1071_v20 = vld [vmem:[%s1294_s4] sm:$0xff]   ;;  %v1062_v23 = vld [vmem:[%s1290_s0 + $0x8] sm:$0xff]   ;;  %v1063_v26 = vld [vmem:[%s1290_s0 + $0x10] sm:$0xff]  }
   0x9   :  { %275 = vperm.xlu0 %1051, %v253_v10   ;;  %999 = vmatpush3.bf16.msra.mxu1 %v1069_v16  ;;  %v260_v24 = vld [vmem:[%s1291_s1 + $0x40] sm:$0xff]  ;;  %v261_v25 = vld [vmem:[%s1291_s1 + $0x48] sm:$0xff]  ;;  %v262_v27 = vld [vmem:[%s1291_s1 + $0x50] sm:$0xff] }
   0xa   :  { %1000 = vmatprep.mubr.msk.bf16.mxu1 %vm438_vm0, %v1070_v17  ;;  %1016 = vmatprep.subr.bf16.mxu1 %v1071_v20  ;;  %v263_v28 = vld [vmem:[%s1291_s1 + $0x58] sm:$0xff]  ;;  %v1075_v30 = vld [vmem:[%s1293_s3 + $0x20] sm:$0xff]   ;;  %v265_v33 = vld [vmem:[%s1291_s1 + $0x68] sm:$0xff] }
   0xb   :  { %971 = vmatpush3.bf16.msra.mxu0 %v1055_v3  ;;  %v1074_v29 = vld [vmem:[%s1293_s3 + $0x18] sm:$0xff]   ;;  %v264_v32 = vld [vmem:[%s1291_s1 + $0x60] sm:$0xff]  ;;  %v266_v35 = vld [vmem:[%s1291_s1 + $0x70] sm:$0xff] }
   0xc   :  { %972 = vmatprep.subr.bf16.mxu0 %v1056_v4  ;;  %295 = vperm.xlu1 %1052, %v257_v14   ;;  %v1064_v31 = vld [vmem:[%s1290_s0 + $0x18] sm:$0xff]   ;;  %v1065_v34 = vld [vmem:[%s1290_s0 + $0x20] sm:$0xff]   ;;  %v1076_v37 = vld [vmem:[%s1293_s3 + $0x28] sm:$0xff]  }
   0xd   :  { %290 = vperm.xlu0 %1051, %v256_v13   ;;  %1001 = vmatmul.mubr.msk.bf16.vlgmr.msra.gmra.mrb[0].mxu1 %vm438_vm0, %v1072_v21  ;;  %v267_v36 = vld [vmem:[%s1291_s1 + $0x78] sm:$0xff]  ;;  %v1077_v38 = vld [vmem:[%s1293_s3 + $0x30] sm:$0xff]   ;;  %v1066_v39 = vld [vmem:[%s1290_s0 + $0x28] sm:$0xff]  }
   0xe   :  { %1017 = vmatpush3.bf16.msra.mxu1 %v1071_v20  ;;  %1004 = vmatprep.mubr.msk.bf16.mxu1 %vm438_vm0, %v1073_v22  ;;  %v1067_v40 = vld [vmem:[%s1290_s0 + $0x30] sm:$0xff]   ;;  %v1068_v41 = vld [vmem:[%s1290_s0 + $0x38] sm:$0xff]  }
   0xf   :  { %973 = vmatpush3.bf16.msra.mxu0 %v1056_v4  ;;  %v1078_v42 = vld [vmem:[%s1293_s3 + $0x38] sm:$0xff]  }
  0x10   :  { %974 = vmatprep.subr.bf16.mxu0 %v1057_v6  ;;  %305 = vperm.xlu1 %1052, %v259_v19  }
  0x11   :  { %300 = vperm.xlu0 %1051, %v258_v18  }
  0x13   :  { %975 = vmatpush3.bf16.msra.mxu0 %v1057_v6 }
  0x14   :  { %976 = vmatprep.subr.bf16.mxu0 %v1058_v7  ;;  %315 = vperm.xlu1 %1052, %v261_v25  }
  0x15   :  { %310 = vperm.xlu0 %1051, %v260_v24   ;;  %1005 = vmatmul.mubr.msk.bf16.gmra.mrb[4].mxu1 %vm438_vm0, %v1074_v29 }
  0x16   :  { %1008 = vmatprep.mubr.msk.bf16.mxu1 %vm438_vm0, %v1075_v30 }
  0x17   :  { %977 = vmatpush3.bf16.msra.mxu0 %v1058_v7 }
  0x18   :  { %978 = vmatprep.subr.bf16.mxu0 %v1059_v12  ;;  %325 = vperm.xlu1 %1052, %v263_v28  }
  0x19   :  { %320 = vperm.xlu0 %1051, %v262_v27  }
  0x1b   :  { %979 = vmatpush3.bf16.msra.mxu0 %v1059_v12 }
  0x1c   :  { %980 = vmatprep.subr.bf16.mxu0 %v1060_v15  ;;  %335 = vperm.xlu1 %1052, %v265_v33  }
  0x1d   :  { %330 = vperm.xlu0 %1051, %v264_v32   ;;  %1009 = vmatmul.mubr.msk.bf16.gmra.mrb[8].mxu1 %vm438_vm0, %v1076_v37 }
  0x1e   :  { %1012 = vmatprep.mubr.msk.bf16.mxu1 %vm438_vm0, %v1077_v38 }
  0x1f   :  { %981 = vmatpush3.bf16.msra.mxu0 %v1060_v15 }
  0x20   :  { %345 = vperm.xlu1 %1052, %v267_v36  }
  0x21   :  { %340 = vperm.xlu0 %1051, %v266_v35   ;;  %v852_v35 = vld [vmem:[%s1295_s6] ss:$0 sm:$0xff] }
  0x22   :  { %983 = vmatmul.mubr.bf16.vlgmr.msra.gmra.mrb[0].mxu0 %v1062_v23 }
  0x23   :  { %986 = vmatprep.mubr.bf16.mxu0 %v1063_v26 }
  0x25   :  { %1013 = vmatmul.mubr.msk.bf16.gmra.mrb[12].mxu1 %vm438_vm0, %v1078_v42 }
  0x2a   :  { %987 = vmatmul.mubr.bf16.gmra.mrb[4].mxu0 %v1064_v31 }
  0x2b   :  { %990 = vmatprep.mubr.bf16.mxu0 %v1065_v34 }
  0x32   :  { %991 = vmatmul.mubr.bf16.gmra.mrb[8].mxu0 %v1066_v39 }
  0x33   :  { %994 = vmatprep.mubr.bf16.mxu0 %v1067_v40 }
  0x3a   :  { %995 = vmatmul.mubr.bf16.gmra.mrb[12].mxu0 %v1068_v41 }
  0x83   :  { %v281_v44 = vpop.permute.xlu1 %280 }
  0x84   :  { %v271_v43 = vpop.permute.xlu0 %270 }
  0x87   :  { %v286_v46 = vpop.permute.xlu1 %285 }
  0x88   :  { %v276_v45 = vpop.permute.xlu0 %275 }
  0x8b   :  { %v296_v48 = vpop.permute.xlu1 %295 }
  0x8c   :  { %v291_v47 = vpop.permute.xlu0 %290 }
  0x8f   :  { %v306_v52 = vpop.permute.xlu1 %305 }
  0x90   :  { %v301_v50 = vpop.permute.xlu0 %300 }
  0x93   :  { %v316_v62 = vpop.permute.xlu1 %315 }
  0x94   :  { %v311_v61 = vpop.permute.xlu0 %310 }
  0x97   :  { %v326_v9 = vpop.permute.xlu1 %325 }
  0x98   :  { %v321_v7 = vpop.permute.xlu0 %320 }
  0x9b   :  { %v336_v18 = vpop.permute.xlu1 %335 }
  0x9c   :  { %v331_v14 = vpop.permute.xlu0 %330 }
  0x9f   :  { %v346_v26 = vpop.permute.xlu1 %345 }
  0xa0   :  { %v341_v24 = vpop.permute.xlu0 %340 }
  0xf5   :  { %v984_v49 = vpop.f32.mrb[0].mxu0 }
  0xf6   :  { %v189_v51 = vpop.f32.mrb[1].mxu0  ;;  %v350_v54 = vmul.f32 %v984_v49, %v281_v44 }
  0xf7   :  { %v985_v53 = vpop.f32.mrb[2].mxu0  ;;  %v348_v57 = vmul.f32 %v271_v43, %v189_v51 }
  0xf8   :  { %v351_v55 = vmul.f32 %v985_v53, %v286_v46  ;;  %v192_v56 = vpop.f32.mrb[3].mxu0 }
  0xf9   :  { %v349_v58 = vmul.f32 %v276_v45, %v192_v56 }
  0xfa   :  { %v365_v59 = vpack.c.bf16 %v351_v55, %v350_v54 }
  0xfb   :  { %v364_v60 = vpack.c.bf16 %v349_v58, %v348_v57 }
  0xfd   :  { %v988_v63 = vpop.f32.mrb[4].mxu0  ;;  %1018 = vmatprep.mubr.msk.bf16.mxu1 %vm438_vm0, %v364_v60 }
  0xfe   :  { %v205_v0 = vpop.f32.mrb[5].mxu0  ;;  %1019 = vmatmul.mubr.msk.bf16.vlgmr.msra.gmra.mrb[0].mxu1 %vm438_vm0, %v365_v59  ;;  %v354_v2 = vmul.f32 %v988_v63, %v301_v50 }
  0xff   :  { %v989_v1 = vpop.f32.mrb[6].mxu0  ;;  %v352_v5 = vmul.f32 %v291_v47, %v205_v0 }
 0x100   :  { %v355_v3 = vmul.f32 %v989_v1, %v306_v52  ;;  %v208_v4 = vpop.f32.mrb[7].mxu0 }
 0x101   :  { %v353_v6 = vmul.f32 %v296_v48, %v208_v4 }
 0x102   :  { %v367_v8 = vpack.c.bf16 %v355_v3, %v354_v2 }
 0x103   :  { %v366_v10 = vpack.c.bf16 %v353_v6, %v352_v5 }
 0x105   :  { %v992_v11 = vpop.f32.mrb[8].mxu0  ;;  %1022 = vmatprep.mubr.msk.bf16.mxu1 %vm438_vm0, %v366_v10 }
 0x106   :  { %v221_v12 = vpop.f32.mrb[9].mxu0  ;;  %1023 = vmatmul.mubr.msk.bf16.gmra.mrb[4].mxu1 %vm438_vm0, %v367_v8  ;;  %v358_v15 = vmul.f32 %v992_v11, %v321_v7 }
 0x107   :  { %v993_v13 = vpop.f32.mrb[10].mxu0  ;;  %v356_v19 = vmul.f32 %v311_v61, %v221_v12 }
 0x108   :  { %v359_v16 = vmul.f32 %v993_v13, %v326_v9  ;;  %v224_v17 = vpop.f32.mrb[11].mxu0 }
 0x109   :  { %v357_v20 = vmul.f32 %v316_v62, %v224_v17 }
 0x10a   :  { %v369_v21 = vpack.c.bf16 %v359_v16, %v358_v15 }
 0x10b   :  { %v368_v22 = vpack.c.bf16 %v357_v20, %v356_v19 }
 0x10d   :  { %v996_v23 = vpop.f32.mrb[12].mxu0  ;;  %1026 = vmatprep.mubr.msk.bf16.mxu1 %vm438_vm0, %v368_v22 }
 0x10e   :  { %v237_v25 = vpop.f32.mrb[13].mxu0  ;;  %1027 = vmatmul.mubr.msk.bf16.gmra.mrb[8].mxu1 %vm438_vm0, %v369_v21  ;;  %v362_v28 = vmul.f32 %v996_v23, %v341_v24 }
 0x10f   :  { %v997_v27 = vpop.f32.mrb[14].mxu0  ;;  %v360_v31 = vmul.f32 %v331_v14, %v237_v25 }
 0x110   :  { %v363_v29 = vmul.f32 %v997_v27, %v346_v26  ;;  %v240_v30 = vpop.f32.mrb[15].mxu0 }
 0x111   :  { %v361_v32 = vmul.f32 %v336_v18, %v240_v30 }
 0x112   :  { %v371_v33 = vpack.c.bf16 %v363_v29, %v362_v28 }
 0x113   :  { %v370_v34 = vpack.c.bf16 %v361_v32, %v360_v31 }
 0x115   :  { %1030 = vmatprep.mubr.msk.bf16.mxu1 %vm438_vm0, %v370_v34 }
 0x116   :  { %1031 = vmatmul.mubr.msk.bf16.gmra.mrb[12].mxu1 %vm438_vm0, %v371_v33 }
 0x1d1   :  { %v1020_v36 = vpop.f32.mrb[0].mxu1 }
 0x1d2   :  { %v696_v37 = vadd.f32 %v1020_v36, %v852_v35  ;;  %v624_v38 = vpop.f32.mrb[1].mxu1 }
 0x1d3   :  { %v694_v39 = vadd.f32 %v852_v35, %v624_v38  ;;  %v1021_v40 = vpop.f32.mrb[2].mxu1 }
 0x1d4   :  { %v697_v41 = vadd.f32 %v1021_v40, %v852_v35  ;;  %v627_v42 = vpop.f32.mrb[3].mxu1  ;;  %v712_v44 = vmax.f32 %v696_v37, 0.0 }
 0x1d5   :  { %v695_v43 = vadd.f32 %v852_v35, %v627_v42  ;;  %v710_v46 = vmax.f32 %v694_v39, 0.0 }
 0x1d6   :  { %v713_v45 = vmax.f32 %v697_v41, 0.0 }
 0x1d7   :  { %v711_v47 = vmax.f32 %v695_v43, 0.0 }
 0x1d8   :  { %v893_v48 = vpack.c.bf16 %v713_v45, %v712_v44 }
 0x1d9   :  { %v888_v49 = vpack.c.bf16 %v711_v47, %v710_v46  ;;  %v1024_v50 = vpop.f32.mrb[4].mxu1 }
 0x1da   :  { %925 = vst [vmem:[%s1296_s7 + $0x8] sm:$0xff] %v893_v48   ;;  %v700_v51 = vadd.f32 %v1024_v50, %v852_v35  ;;  %v640_v52 = vpop.f32.mrb[5].mxu1 }
 0x1db   :  { %889 = vst [vmem:[%s1296_s7] sm:$0xff] %v888_v49   ;;  %v698_v53 = vadd.f32 %v852_v35, %v640_v52  ;;  %v1025_v54 = vpop.f32.mrb[6].mxu1 }
 0x1dc   :  { %v701_v55 = vadd.f32 %v1025_v54, %v852_v35  ;;  %v643_v56 = vpop.f32.mrb[7].mxu1  ;;  %v716_v58 = vmax.f32 %v700_v51, 0.0 }
 0x1dd   :  { %v699_v57 = vadd.f32 %v852_v35, %v643_v56  ;;  %v714_v60 = vmax.f32 %v698_v53, 0.0 }
 0x1de   :  { %v717_v59 = vmax.f32 %v701_v55, 0.0 }
 0x1df   :  { %v715_v61 = vmax.f32 %v699_v57, 0.0 }
 0x1e0   :  { %v903_v62 = vpack.c.bf16 %v717_v59, %v716_v58 }
 0x1e1   :  { %v898_v63 = vpack.c.bf16 %v715_v61, %v714_v60  ;;  %v1028_v0 = vpop.f32.mrb[8].mxu1 }
 0x1e2   :  { %927 = vst [vmem:[%s1296_s7 + $0x18] sm:$0xff] %v903_v62   ;;  %v704_v1 = vadd.f32 %v1028_v0, %v852_v35  ;;  %v656_v2 = vpop.f32.mrb[9].mxu1 }
 0x1e3   :  { %926 = vst [vmem:[%s1296_s7 + $0x10] sm:$0xff] %v898_v63   ;;  %v702_v3 = vadd.f32 %v852_v35, %v656_v2  ;;  %v1029_v4 = vpop.f32.mrb[10].mxu1 }
 0x1e4   :  { %v705_v5 = vadd.f32 %v1029_v4, %v852_v35  ;;  %v659_v6 = vpop.f32.mrb[11].mxu1  ;;  %v720_v8 = vmax.f32 %v704_v1, 0.0 }
 0x1e5   :  { %v703_v7 = vadd.f32 %v852_v35, %v659_v6  ;;  %v718_v10 = vmax.f32 %v702_v3, 0.0 }
 0x1e6   :  { %v721_v9 = vmax.f32 %v705_v5, 0.0 }
 0x1e7   :  { %v719_v11 = vmax.f32 %v703_v7, 0.0 }
 0x1e8   :  { %v913_v12 = vpack.c.bf16 %v721_v9, %v720_v8 }
 0x1e9   :  { %v908_v13 = vpack.c.bf16 %v719_v11, %v718_v10  ;;  %v1032_v14 = vpop.f32.mrb[12].mxu1 }
 0x1ea   :  { %929 = vst [vmem:[%s1296_s7 + $0x28] sm:$0xff] %v913_v12   ;;  %v708_v15 = vadd.f32 %v1032_v14, %v852_v35  ;;  %v672_v16 = vpop.f32.mrb[13].mxu1 }
 0x1eb   :  { %928 = vst [vmem:[%s1296_s7 + $0x20] sm:$0xff] %v908_v13   ;;  %v706_v17 = vadd.f32 %v852_v35, %v672_v16  ;;  %v1033_v18 = vpop.f32.mrb[14].mxu1 }
 0x1ec   :  { %v709_v19 = vadd.f32 %v1033_v18, %v852_v35  ;;  %v675_v20 = vpop.f32.mrb[15].mxu1  ;;  %v724_v22 = vmax.f32 %v708_v15, 0.0 }
 0x1ed   :  { %v707_v21 = vadd.f32 %v852_v35, %v675_v20  ;;  %v722_v24 = vmax.f32 %v706_v17, 0.0 }
 0x1ee   :  { %v725_v23 = vmax.f32 %v709_v19, 0.0 }
 0x1ef   :  { %v723_v25 = vmax.f32 %v707_v21, 0.0 }
 0x1f0   :  { %v923_v26 = vpack.c.bf16 %v725_v23, %v724_v22 }
 0x1f1   :  { %v918_v27 = vpack.c.bf16 %v723_v25, %v722_v24 }
 0x1f2   :  { %931 = vst [vmem:[%s1296_s7 + $0x38] sm:$0xff] %v923_v26  }
 0x1f3   :  { %930 = vst [vmem:[%s1296_s7 + $0x30] sm:$0xff] %v918_v27  }

// kernel: _lambda_.3
= control target key start
LH: loop header
LB: loop body
LE: loop exit
PB: predicated region body
PF: predicated region fallthrough
CT: control target
= control target key end

     0   :  { %v1846_v1 = vmov 0   ;;  %s2419_s2 = inlined_call_operand.vmem [shape: bf16[128,128], index: 2, kind: input, shape index: {}, may-alias: {2,3}]   ;;  %s2420_s0 = inlined_call_operand.vmem [shape: bf16[128,128], index: 0, kind: input, shape index: {}]   ;;  %s2421_s1 = inlined_call_operand.vmem [shape: f32[128,1], index: 1, kind: input, shape index: {}]   ;;  %s2422_s5 = inlined_call_operand.vmem [shape: bf16[128,128], index: 5, kind: input, shape index: {}]   ;;  %s2423_s3 = inlined_call_operand.vmem [shape: bf16[128,128], index: 3, kind: input, shape index: {}, may-alias: {2,3}]   ;;  %s2424_s4 = inlined_call_operand.vmem [shape: bf16[128,128], index: 4, kind: input, shape index: {}]   ;;  %s2425_s7 = inlined_call_operand.vmem [shape: bf16[128,128], index: 7, kind: input, shape index: {}]   ;;  %s2426_s9 = inlined_call_operand.vmem [shape: bf16[128,128], index: 9, kind: input, shape index: {}]   ;;  %s2427_s6 = inlined_call_operand.vmem [shape: f32[1,128], index: 6, kind: input, shape index: {}]   ;;  %s2428_s8 = inlined_call_operand.vmem [shape: f32[1,128], index: 8, kind: input, shape index: {}]   ;;  %s2429_s10 = inlined_call_operand.vmem [shape: f32[1,128], index: 10, kind: input, shape index: {}]   ;;  %s2430_s11 = inlined_call_operand.vmem [shape: f32[128,128], index: 11, kind: output, shape index: {}]  }
   0x1   :  { %v1726_v0 = vld [vmem:[%s2419_s2] sm:$0xff]   ;;  %1724 = vset.pattern.permute.xlu0 %v1846_v1  ;;  %1725 = vset.pattern.permute.xlu1 %v1846_v1  ;;  %v1727_v2 = vld [vmem:[%s2419_s2 + $0x8] sm:$0xff]   ;;  %v1728_v3 = vld [vmem:[%s2419_s2 + $0x10] sm:$0xff]  }
   0x2   :  { %1531 = vmatprep.subr.bf16.mxu0 %v1726_v0  ;;  %v1729_v4 = vld [vmem:[%s2419_s2 + $0x18] sm:$0xff]   ;;  %v1734_v5 = vld [vmem:[%s2420_s0] sm:$0xff]   ;;  %v1731_v7 = vld [vmem:[%s2419_s2 + $0x28] sm:$0xff]  }
   0x3   :  { %1532 = vmatpush3.bf16.msra.mxu0 %v1726_v0  ;;  %1547 = vmatprep.mubr.bf16.mxu0 %v1734_v5  ;;  %v1730_v6 = vld [vmem:[%s2419_s2 + $0x20] sm:$0xff]   ;;  %v266_v9 = vld [vmem:[%s2421_s1 + $0x10] sm:$0xff]  ;;  %v265_v10 = vld [vmem:[%s2421_s1 + $0x8] sm:$0xff] }
   0x4   :  { %1533 = vmatprep.subr.bf16.mxu0 %v1727_v2  ;;  %v264_v8 = vld [vmem:[%s2421_s1] sm:$0xff]  ;;  %292 = vperm.xlu1 %1725, %v266_v9   ;;  %v267_v11 = vld [vmem:[%s2421_s1 + $0x18] sm:$0xff]  ;;  %v1732_v12 = vld [vmem:[%s2419_s2 + $0x30] sm:$0xff]  }
   0x5   :  { %282 = vperm.xlu0 %1724, %v264_v8   ;;  %v268_v13 = vld [vmem:[%s2421_s1 + $0x20] sm:$0xff]  ;;  %v269_v14 = vld [vmem:[%s2421_s1 + $0x28] sm:$0xff]  ;;  %v1733_v17 = vld [vmem:[%s2419_s2 + $0x38] sm:$0xff]  }
   0x6   :  { %v1742_v15 = vld [vmem:[%s2422_s5] sm:$0xff]   ;;  %v1743_v16 = vld [vmem:[%s2422_s5 + $0x8] sm:$0xff]   ;;  %v270_v18 = vld [vmem:[%s2421_s1 + $0x30] sm:$0xff] }
   0x7   :  { %1534 = vmatpush3.bf16.msra.mxu0 %v1727_v2  ;;  %1563 = vmatprep.subr.bf16.mxu1 %v1742_v15  ;;  %v271_v19 = vld [vmem:[%s2421_s1 + $0x38] sm:$0xff]  ;;  %v1744_v20 = vld [vmem:[%s2422_s5 + $0x10] sm:$0xff]   ;;  %v1735_v21 = vld [vmem:[%s2420_s0 + $0x8] sm:$0xff]  }
   0x8   :  { %1535 = vmatprep.subr.bf16.mxu0 %v1728_v3  ;;  %297 = vperm.xlu1 %1725, %v267_v11   ;;  %v272_v22 = vld [vmem:[%s2421_s1 + $0x40] sm:$0xff]  ;;  %v1736_v23 = vld [vmem:[%s2420_s0 + $0x10] sm:$0xff]   ;;  %v273_v24 = vld [vmem:[%s2421_s1 + $0x48] sm:$0xff] }
   0x9   :  { %287 = vperm.xlu0 %1724, %v265_v10   ;;  %1564 = vmatpush3.bf16.msra.mxu1 %v1742_v15  ;;  %v1750_v25 = vld [vmem:[%s2423_s3] sm:$0xff]   ;;  %v1745_v26 = vld [vmem:[%s2422_s5 + $0x18] sm:$0xff]   ;;  %v274_v27 = vld [vmem:[%s2421_s1 + $0x50] sm:$0xff] }
   0xa   :  { %1565 = vmatprep.subr.bf16.mxu1 %v1743_v16  ;;  %1579 = vmatprep.mubr.bf16.mxu1 %v1750_v25  ;;  %v275_v28 = vld [vmem:[%s2421_s1 + $0x58] sm:$0xff]  ;;  %v1746_v29 = vld [vmem:[%s2422_s5 + $0x20] sm:$0xff]   ;;  %v277_v33 = vld [vmem:[%s2421_s1 + $0x68] sm:$0xff] }
   0xb   :  { %1536 = vmatpush3.bf16.msra.mxu0 %v1728_v3  ;;  %v1737_v30 = vld [vmem:[%s2420_s0 + $0x18] sm:$0xff]   ;;  %v1738_v31 = vld [vmem:[%s2420_s0 + $0x20] sm:$0xff]   ;;  %v1747_v34 = vld [vmem:[%s2422_s5 + $0x28] sm:$0xff]  }
   0xc   :  { %1537 = vmatprep.subr.bf16.mxu0 %v1729_v4  ;;  %307 = vperm.xlu1 %1725, %v269_v14   ;;  %v276_v32 = vld [vmem:[%s2421_s1 + $0x60] sm:$0xff]  ;;  %v278_v35 = vld [vmem:[%s2421_s1 + $0x70] sm:$0xff]  ;;  %v279_v36 = vld [vmem:[%s2421_s1 + $0x78] sm:$0xff] }
   0xd   :  { %302 = vperm.xlu0 %1724, %v268_v13   ;;  %1566 = vmatpush3.bf16.msra.mxu1 %v1743_v16  ;;  %v1748_v37 = vld [vmem:[%s2422_s5 + $0x30] sm:$0xff]   ;;  %v1739_v38 = vld [vmem:[%s2420_s0 + $0x28] sm:$0xff]   ;;  %v1749_v40 = vld [vmem:[%s2422_s5 + $0x38] sm:$0xff]  }
   0xe   :  { %1567 = vmatprep.subr.bf16.mxu1 %v1744_v20  ;;  %v1740_v39 = vld [vmem:[%s2420_s0 + $0x30] sm:$0xff]   ;;  %v1751_v41 = vld [vmem:[%s2424_s4] sm:$0xff]   ;;  %v1752_v42 = vld [vmem:[%s2423_s3 + $0x8] sm:$0xff]  }
   0xf   :  { %1538 = vmatpush3.bf16.msra.mxu0 %v1729_v4  ;;  %v1741_v43 = vld [vmem:[%s2420_s0 + $0x38] sm:$0xff]   ;;  %v1753_v44 = vld [vmem:[%s2424_s4 + $0x8] sm:$0xff]   ;;  %v1754_v45 = vld [vmem:[%s2423_s3 + $0x10] sm:$0xff]  }
  0x10   :  { %1539 = vmatprep.subr.bf16.mxu0 %v1730_v6  ;;  %317 = vperm.xlu1 %1725, %v271_v19   ;;  %v1755_v46 = vld [vmem:[%s2424_s4 + $0x10] sm:$0xff]   ;;  %v1756_v47 = vld [vmem:[%s2423_s3 + $0x18] sm:$0xff]   ;;  %v1758_v48 = vld [vmem:[%s2423_s3 + $0x20] sm:$0xff]  }
  0x11   :  { %312 = vperm.xlu0 %1724, %v270_v18   ;;  %1568 = vmatpush3.bf16.msra.mxu1 %v1744_v20  ;;  %v1757_v49 = vld [vmem:[%s2424_s4 + $0x18] sm:$0xff]   ;;  %v1759_v50 = vld [vmem:[%s2424_s4 + $0x20] sm:$0xff]   ;;  %v1760_v51 = vld [vmem:[%s2423_s3 + $0x28] sm:$0xff]  }
  0x12   :  { %1569 = vmatprep.subr.bf16.mxu1 %v1745_v26  ;;  %v1762_v52 = vld [vmem:[%s2423_s3 + $0x30] sm:$0xff]   ;;  %v1761_v53 = vld [vmem:[%s2424_s4 + $0x28] sm:$0xff]   ;;  %v1764_v55 = vld [vmem:[%s2423_s3 + $0x38] sm:$0xff]  }
  0x13   :  { %1540 = vmatpush3.bf16.msra.mxu0 %v1730_v6  ;;  %v1763_v54 = vld [vmem:[%s2424_s4 + $0x30] sm:$0xff]   ;;  %v1765_v56 = vld [vmem:[%s2424_s4 + $0x38] sm:$0xff]   ;;  %v1766_v57 = vld [vmem:[%s2425_s7] sm:$0xff]  }
  0x14   :  { %1541 = vmatprep.subr.bf16.mxu0 %v1731_v7  ;;  %327 = vperm.xlu1 %1725, %v273_v24   ;;  %v1767_v58 = vld [vmem:[%s2425_s7 + $0x8] sm:$0xff]   ;;  %v1768_v59 = vld [vmem:[%s2425_s7 + $0x10] sm:$0xff]   ;;  %v1769_v60 = vld [vmem:[%s2425_s7 + $0x18] sm:$0xff]  }
  0x15   :  { %322 = vperm.xlu0 %1724, %v272_v22   ;;  %1570 = vmatpush3.bf16.msra.mxu1 %v1745_v26  ;;  %v1770_v61 = vld [vmem:[%s2425_s7 + $0x20] sm:$0xff]   ;;  %v1771_v62 = vld [vmem:[%s2425_s7 + $0x28] sm:$0xff]  }
  0x16   :  { %1571 = vmatprep.subr.bf16.mxu1 %v1746_v29 }
  0x17   :  { %1542 = vmatpush3.bf16.msra.mxu0 %v1731_v7 }
  0x18   :  { %1543 = vmatprep.subr.bf16.mxu0 %v1732_v12  ;;  %337 = vperm.xlu1 %1725, %v275_v28  }
  0x19   :  { %332 = vperm.xlu0 %1724, %v274_v27   ;;  %1572 = vmatpush3.bf16.msra.mxu1 %v1746_v29 }
  0x1a   :  { %1573 = vmatprep.subr.bf16.mxu1 %v1747_v34 }
  0x1b   :  { %1544 = vmatpush3.bf16.msra.mxu0 %v1732_v12 }
  0x1c   :  { %1545 = vmatprep.subr.bf16.mxu0 %v1733_v17  ;;  %347 = vperm.xlu1 %1725, %v277_v33  }
  0x1d   :  { %342 = vperm.xlu0 %1724, %v276_v32   ;;  %1574 = vmatpush3.bf16.msra.mxu1 %v1747_v34 }
  0x1e   :  { %1575 = vmatprep.subr.bf16.mxu1 %v1748_v37 }
  0x1f   :  { %1546 = vmatpush3.bf16.msra.mxu0 %v1733_v17 }
  0x20   :  { %357 = vperm.xlu1 %1725, %v279_v36   ;;  %1627 = vmatprep.subr.bf16.mxu0 %v1766_v57 }
  0x21   :  { %352 = vperm.xlu0 %1724, %v278_v35   ;;  %1576 = vmatpush3.bf16.msra.mxu1 %v1748_v37 }
  0x22   :  { %1548 = vmatmul.mubr.bf16.vlgmr.msra.gmra.mrb[0].mxu0 %v1735_v21  ;;  %1577 = vmatprep.subr.bf16.mxu1 %v1749_v40 }
  0x23   :  { %1551 = vmatprep.mubr.bf16.mxu0 %v1736_v23  ;;  %1628 = vmatpush3.bf16.msra.mxu0 %v1766_v57  ;;  %v1774_v57 = vld [vmem:[%s2426_s9] sm:$0xff]  }
  0x24   :  { %1629 = vmatprep.subr.bf16.mxu0 %v1767_v58 }
  0x25   :  { %1578 = vmatpush3.bf16.msra.mxu1 %v1749_v40 }
  0x26   :  { %1595 = vmatprep.subr.bf16.mxu1 %v1751_v41 }
  0x27   :  { %1630 = vmatpush3.bf16.msra.mxu0 %v1767_v58  ;;  %v1775_v58 = vld [vmem:[%s2426_s9 + $0x8] sm:$0xff]  }
  0x28   :  { %1580 = vmatmul.mubr.bf16.vlgmr.msra.gmra.mrb[0].mxu1 %v1752_v42  ;;  %1631 = vmatprep.subr.bf16.mxu0 %v1768_v59 }
  0x29   :  { %1596 = vmatpush3.bf16.msra.mxu1 %v1751_v41  ;;  %1583 = vmatprep.mubr.bf16.mxu1 %v1754_v45 }
  0x2a   :  { %1552 = vmatmul.mubr.bf16.gmra.mrb[4].mxu0 %v1737_v30  ;;  %1597 = vmatprep.subr.bf16.mxu1 %v1753_v44 }
  0x2b   :  { %1555 = vmatprep.mubr.bf16.mxu0 %v1738_v31  ;;  %1632 = vmatpush3.bf16.msra.mxu0 %v1768_v59  ;;  %v1776_v59 = vld [vmem:[%s2426_s9 + $0x10] sm:$0xff]  }
  0x2c   :  { %1633 = vmatprep.subr.bf16.mxu0 %v1769_v60 }
  0x2d   :  { %1598 = vmatpush3.bf16.msra.mxu1 %v1753_v44 }
  0x2e   :  { %1599 = vmatprep.subr.bf16.mxu1 %v1755_v46 }
  0x2f   :  { %1634 = vmatpush3.bf16.msra.mxu0 %v1769_v60  ;;  %v2111_v60 = vld [vmem:[%s2426_s9 + $0x18] sm:$0xff]  }
  0x30   :  { %1584 = vmatmul.mubr.bf16.gmra.mrb[4].mxu1 %v1756_v47  ;;  %1635 = vmatprep.subr.bf16.mxu0 %v1770_v61 }
  0x31   :  { %1600 = vmatpush3.bf16.msra.mxu1 %v1755_v46  ;;  %1587 = vmatprep.mubr.bf16.mxu1 %v1758_v48 }
  0x32   :  { %1556 = vmatmul.mubr.bf16.gmra.mrb[8].mxu0 %v1739_v38  ;;  %1601 = vmatprep.subr.bf16.mxu1 %v1757_v49 }
  0x33   :  { %1559 = vmatprep.mubr.bf16.mxu0 %v1740_v39  ;;  %1636 = vmatpush3.bf16.msra.mxu0 %v1770_v61  ;;  %v2117_v61 = vld [vmem:[%s2426_s9 + $0x20] sm:$0xff]  }
  0x34   :  { %1637 = vmatprep.subr.bf16.mxu0 %v1771_v62 }
  0x35   :  { %1602 = vmatpush3.bf16.msra.mxu1 %v1757_v49 }
  0x36   :  { %1603 = vmatprep.subr.bf16.mxu1 %v1759_v50 }
  0x37   :  { %1638 = vmatpush3.bf16.msra.mxu0 %v1771_v62  ;;  %v2124_v62 = vld [vmem:[%s2426_s9 + $0x28] sm:$0xff]  }
  0x38   :  { %1588 = vmatmul.mubr.bf16.gmra.mrb[8].mxu1 %v1760_v51 }
  0x39   :  { %1604 = vmatpush3.bf16.msra.mxu1 %v1759_v50  ;;  %1591 = vmatprep.mubr.bf16.mxu1 %v1762_v52 }
  0x3a   :  { %1560 = vmatmul.mubr.bf16.gmra.mrb[12].mxu0 %v1741_v43  ;;  %1605 = vmatprep.subr.bf16.mxu1 %v1761_v53 }
  0x3d   :  { %1606 = vmatpush3.bf16.msra.mxu1 %v1761_v53 }
  0x3e   :  { %1607 = vmatprep.subr.bf16.mxu1 %v1763_v54 }
  0x40   :  { %1592 = vmatmul.mubr.bf16.gmra.mrb[12].mxu1 %v1764_v55  ;;  %v1772_v55 = vld [vmem:[%s2425_s7 + $0x30] sm:$0xff]  }
  0x41   :  { %1608 = vmatpush3.bf16.msra.mxu1 %v1763_v54  ;;  %1639 = vmatprep.subr.bf16.mxu0 %v1772_v55 }
  0x42   :  { %1609 = vmatprep.subr.bf16.mxu1 %v1765_v56  ;;  %1640 = vmatpush3.bf16.msra.mxu0 %v1772_v55 }
  0x45   :  { %1610 = vmatpush3.bf16.msra.mxu1 %v1765_v56  ;;  %v1773_v56 = vld [vmem:[%s2425_s7 + $0x38] sm:$0xff]  }
  0x46   :  { %1641 = vmatprep.subr.bf16.mxu0 %v1773_v56  ;;  %1691 = vmatprep.subr.bf16.mxu1 %v1774_v57 }
  0x47   :  { %1642 = vmatpush3.bf16.msra.mxu0 %v1773_v56  ;;  %v1780_v56 = vld [vmem:[%s2426_s9 + $0x30] sm:$0xff]  }
  0x48   :  { %1659 = vmatprep.subr.bf16.mxu0 %v1774_v57 }
  0x83   :  { %v293_v0 = vpop.permute.xlu1 %292 }
  0x84   :  { %v283_v63 = vpop.permute.xlu0 %282 }
  0x87   :  { %v298_v2 = vpop.permute.xlu1 %297 }
  0x88   :  { %v288_v1 = vpop.permute.xlu0 %287 }
  0x8b   :  { %v308_v4 = vpop.permute.xlu1 %307 }
  0x8c   :  { %v303_v3 = vpop.permute.xlu0 %302 }
  0x8f   :  { %v318_v8 = vpop.permute.xlu1 %317 }
  0x90   :  { %v313_v6 = vpop.permute.xlu0 %312 }
  0x93   :  { %v328_v18 = vpop.permute.xlu1 %327 }
  0x94   :  { %v323_v17 = vpop.permute.xlu0 %322 }
  0x97   :  { %v338_v29 = vpop.permute.xlu1 %337 }
  0x98   :  { %v333_v27 = vpop.permute.xlu0 %332 }
  0x9b   :  { %v348_v38 = vpop.permute.xlu1 %347 }
  0x9c   :  { %v343_v34 = vpop.permute.xlu0 %342 }
  0x9f   :  { %v358_v46 = vpop.permute.xlu1 %357 }
  0xa0   :  { %v353_v44 = vpop.permute.xlu0 %352 }
  0xf5   :  { %v1549_v5 = vpop.f32.mrb[0].mxu0 }
  0xf6   :  { %v201_v7 = vpop.f32.mrb[1].mxu0  ;;  %v362_v10 = vmul.f32 %v1549_v5, %v293_v0 }
  0xf7   :  { %v1550_v9 = vpop.f32.mrb[2].mxu0  ;;  %v360_v13 = vmul.f32 %v283_v63, %v201_v7  ;;  %v2132_v63 = vld [vmem:[%s2427_s6] ss:$0 sm:$0xff] }
  0xf8   :  { %v363_v11 = vmul.f32 %v1550_v9, %v298_v2  ;;  %v204_v12 = vpop.f32.mrb[3].mxu0 }
  0xf9   :  { %v361_v14 = vmul.f32 %v288_v1, %v204_v12 }
  0xfa   :  { %v377_v15 = vpack.c.bf16 %v363_v11, %v362_v10 }
  0xfb   :  { %v376_v16 = vpack.c.bf16 %v361_v14, %v360_v13 }
  0xfd   :  { %v1553_v19 = vpop.f32.mrb[4].mxu0  ;;  %1611 = vmatprep.mubr.bf16.mxu1 %v376_v16 }
  0xfe   :  { %v217_v20 = vpop.f32.mrb[5].mxu0  ;;  %1612 = vmatmul.mubr.bf16.vlgmr.msra.gmra.mrb[0].mxu1 %v377_v15  ;;  %v366_v22 = vmul.f32 %v1553_v19, %v313_v6 }
  0xff   :  { %v1554_v21 = vpop.f32.mrb[6].mxu0  ;;  %v364_v25 = vmul.f32 %v303_v3, %v217_v20  ;;  %1699 = vmatpush3.bf16.msra.mxu1 %v1774_v57 }
 0x100   :  { %v367_v23 = vmul.f32 %v1554_v21, %v318_v8  ;;  %v220_v24 = vpop.f32.mrb[7].mxu0  ;;  %1692 = vmatprep.subr.bf16.mxu1 %v1775_v58 }
 0x101   :  { %v365_v26 = vmul.f32 %v308_v4, %v220_v24 }
 0x102   :  { %v379_v28 = vpack.c.bf16 %v367_v23, %v366_v22 }
 0x103   :  { %v378_v30 = vpack.c.bf16 %v365_v26, %v364_v25  ;;  %1700 = vmatpush3.bf16.msra.mxu1 %v1775_v58 }
 0x104   :  { %1693 = vmatprep.subr.bf16.mxu1 %v1776_v59 }
 0x105   :  { %v1557_v31 = vpop.f32.mrb[8].mxu0  ;;  %1615 = vmatprep.mubr.bf16.mxu1 %v378_v30 }
 0x106   :  { %v233_v32 = vpop.f32.mrb[9].mxu0  ;;  %1616 = vmatmul.mubr.bf16.gmra.mrb[4].mxu1 %v379_v28  ;;  %v370_v35 = vmul.f32 %v1557_v31, %v333_v27 }
 0x107   :  { %v1558_v33 = vpop.f32.mrb[10].mxu0  ;;  %v368_v39 = vmul.f32 %v323_v17, %v233_v32  ;;  %1701 = vmatpush3.bf16.msra.mxu1 %v1776_v59 }
 0x108   :  { %v371_v36 = vmul.f32 %v1558_v33, %v338_v29  ;;  %v236_v37 = vpop.f32.mrb[11].mxu0  ;;  %1694 = vmatprep.subr.bf16.mxu1 %v2111_v60 }
 0x109   :  { %v369_v40 = vmul.f32 %v328_v18, %v236_v37 }
 0x10a   :  { %v381_v41 = vpack.c.bf16 %v371_v36, %v370_v35 }
 0x10b   :  { %v380_v42 = vpack.c.bf16 %v369_v40, %v368_v39  ;;  %1702 = vmatpush3.bf16.msra.mxu1 %v2111_v60 }
 0x10c   :  { %1695 = vmatprep.subr.bf16.mxu1 %v2117_v61 }
 0x10d   :  { %v1561_v43 = vpop.f32.mrb[12].mxu0  ;;  %1619 = vmatprep.mubr.bf16.mxu1 %v380_v42 }
 0x10e   :  { %v249_v45 = vpop.f32.mrb[13].mxu0  ;;  %1620 = vmatmul.mubr.bf16.gmra.mrb[8].mxu1 %v381_v41  ;;  %v374_v48 = vmul.f32 %v1561_v43, %v353_v44 }
 0x10f   :  { %v1562_v47 = vpop.f32.mrb[14].mxu0  ;;  %v372_v51 = vmul.f32 %v343_v34, %v249_v45  ;;  %1703 = vmatpush3.bf16.msra.mxu1 %v2117_v61 }
 0x110   :  { %v375_v49 = vmul.f32 %v1562_v47, %v358_v46  ;;  %v252_v50 = vpop.f32.mrb[15].mxu0  ;;  %1696 = vmatprep.subr.bf16.mxu1 %v2124_v62 }
 0x111   :  { %v373_v52 = vmul.f32 %v348_v38, %v252_v50 }
 0x112   :  { %v383_v53 = vpack.c.bf16 %v375_v49, %v374_v48 }
 0x113   :  { %v382_v54 = vpack.c.bf16 %v373_v52, %v372_v51  ;;  %1704 = vmatpush3.bf16.msra.mxu1 %v2124_v62 }
 0x114   :  { %1697 = vmatprep.subr.bf16.mxu1 %v1780_v56 }
 0x115   :  { %1623 = vmatprep.mubr.bf16.mxu1 %v382_v54 }
 0x116   :  { %1624 = vmatmul.mubr.bf16.gmra.mrb[12].mxu1 %v383_v53 }
 0x117   :  { %1705 = vmatpush3.bf16.msra.mxu1 %v1780_v56 }
 0x1d1   :  { %v1613_v0 = vpop.f32.mrb[0].mxu1 }
 0x1d2   :  { %v779_v1 = vadd.f32 %v1613_v0, %v2132_v63  ;;  %v707_v2 = vpop.f32.mrb[1].mxu1 }
 0x1d3   :  { %v777_v3 = vadd.f32 %v2132_v63, %v707_v2  ;;  %v1614_v4 = vpop.f32.mrb[2].mxu1 }
 0x1d4   :  { %v780_v5 = vadd.f32 %v1614_v4, %v2132_v63  ;;  %v710_v6 = vpop.f32.mrb[3].mxu1  ;;  %v795_v8 = vmax.f32 %v779_v1, 0.0 }
 0x1d5   :  { %v778_v7 = vadd.f32 %v2132_v63, %v710_v6  ;;  %v793_v10 = vmax.f32 %v777_v3, 0.0 }
 0x1d6   :  { %v796_v9 = vmax.f32 %v780_v5, 0.0 }
 0x1d7   :  { %v794_v11 = vmax.f32 %v778_v7, 0.0 }
 0x1d8   :  { %v810_v12 = vpack.c.bf16 %v796_v9, %v795_v8 }
 0x1d9   :  { %v809_v13 = vpack.c.bf16 %v794_v11, %v793_v10  ;;  %v1617_v14 = vpop.f32.mrb[4].mxu1 }
 0x1da   :  { %v783_v15 = vadd.f32 %v1617_v14, %v2132_v63  ;;  %v723_v16 = vpop.f32.mrb[5].mxu1 }
 0x1db   :  { %v781_v17 = vadd.f32 %v2132_v63, %v723_v16  ;;  %v1618_v18 = vpop.f32.mrb[6].mxu1  ;;  %1643 = vmatprep.mubr.bf16.mxu0 %v809_v13 }
 0x1dc   :  { %v784_v19 = vadd.f32 %v1618_v18, %v2132_v63  ;;  %v726_v20 = vpop.f32.mrb[7].mxu1  ;;  %1644 = vmatmul.mubr.bf16.vlgmr.msra.gmra.mrb[16].mxu0 %v810_v12  ;;  %v799_v22 = vmax.f32 %v783_v15, 0.0 }
 0x1dd   :  { %v782_v21 = vadd.f32 %v2132_v63, %v726_v20  ;;  %1660 = vmatpush3.bf16.msra.mxu0 %v1774_v57  ;;  %v797_v24 = vmax.f32 %v781_v17, 0.0  ;;  %v1781_v57 = vld [vmem:[%s2426_s9 + $0x38] sm:$0xff]  }
 0x1de   :  { %v800_v23 = vmax.f32 %v784_v19, 0.0  ;;  %1661 = vmatprep.subr.bf16.mxu0 %v1775_v58  ;;  %1698 = vmatprep.subr.bf16.mxu1 %v1781_v57 }
 0x1df   :  { %v798_v25 = vmax.f32 %v782_v21, 0.0  ;;  %1706 = vmatpush3.bf16.msra.mxu1 %v1781_v57 }
 0x1e0   :  { %v812_v26 = vpack.c.bf16 %v800_v23, %v799_v22 }
 0x1e1   :  { %v811_v27 = vpack.c.bf16 %v798_v25, %v797_v24  ;;  %v1621_v28 = vpop.f32.mrb[8].mxu1  ;;  %1662 = vmatpush3.bf16.msra.mxu0 %v1775_v58  ;;  %v1433_v58 = vld [vmem:[%s2428_s8] ss:$0 sm:$0xff] }
 0x1e2   :  { %v787_v29 = vadd.f32 %v1621_v28, %v2132_v63  ;;  %v739_v30 = vpop.f32.mrb[9].mxu1  ;;  %1663 = vmatprep.subr.bf16.mxu0 %v1776_v59 }
 0x1e3   :  { %v785_v31 = vadd.f32 %v2132_v63, %v739_v30  ;;  %v1622_v32 = vpop.f32.mrb[10].mxu1  ;;  %1647 = vmatprep.mubr.bf16.mxu0 %v811_v27 }
 0x1e4   :  { %v788_v33 = vadd.f32 %v1622_v32, %v2132_v63  ;;  %v742_v34 = vpop.f32.mrb[11].mxu1  ;;  %1648 = vmatmul.mubr.bf16.gmra.mrb[20].mxu0 %v812_v26  ;;  %v803_v36 = vmax.f32 %v787_v29, 0.0 }
 0x1e5   :  { %v786_v35 = vadd.f32 %v2132_v63, %v742_v34  ;;  %1664 = vmatpush3.bf16.msra.mxu0 %v1776_v59  ;;  %v801_v38 = vmax.f32 %v785_v31, 0.0 }
 0x1e6   :  { %v804_v37 = vmax.f32 %v788_v33, 0.0  ;;  %1665 = vmatprep.subr.bf16.mxu0 %v2111_v60 }
 0x1e7   :  { %v802_v39 = vmax.f32 %v786_v35, 0.0 }
 0x1e8   :  { %v814_v40 = vpack.c.bf16 %v804_v37, %v803_v36 }
 0x1e9   :  { %v813_v41 = vpack.c.bf16 %v802_v39, %v801_v38  ;;  %v1625_v42 = vpop.f32.mrb[12].mxu1  ;;  %1666 = vmatpush3.bf16.msra.mxu0 %v2111_v60 }
 0x1ea   :  { %v791_v43 = vadd.f32 %v1625_v42, %v2132_v63  ;;  %v755_v44 = vpop.f32.mrb[13].mxu1  ;;  %1667 = vmatprep.subr.bf16.mxu0 %v2117_v61 }
 0x1eb   :  { %v789_v45 = vadd.f32 %v2132_v63, %v755_v44  ;;  %v1626_v46 = vpop.f32.mrb[14].mxu1  ;;  %1651 = vmatprep.mubr.bf16.mxu0 %v813_v41 }
 0x1ec   :  { %v792_v47 = vadd.f32 %v1626_v46, %v2132_v63  ;;  %v758_v48 = vpop.f32.mrb[15].mxu1  ;;  %1652 = vmatmul.mubr.bf16.gmra.mrb[24].mxu0 %v814_v40  ;;  %v807_v50 = vmax.f32 %v791_v43, 0.0 }
 0x1ed   :  { %v790_v49 = vadd.f32 %v2132_v63, %v758_v48  ;;  %1668 = vmatpush3.bf16.msra.mxu0 %v2117_v61  ;;  %v805_v52 = vmax.f32 %v789_v45, 0.0 }
 0x1ee   :  { %v808_v51 = vmax.f32 %v792_v47, 0.0  ;;  %1669 = vmatprep.subr.bf16.mxu0 %v2124_v62 }
 0x1ef   :  { %v806_v53 = vmax.f32 %v790_v49, 0.0 }
 0x1f0   :  { %v816_v54 = vpack.c.bf16 %v808_v51, %v807_v50  ;;  %v1177_v51 = vlaneseq }
 0x1f1   :  { %v815_v55 = vpack.c.bf16 %v806_v53, %v805_v52  ;;  %1670 = vmatpush3.bf16.msra.mxu0 %v2124_v62  ;;  %v1442_v53 = vld [vmem:[%s2429_s10] ss:$0 sm:$0xff] }
 0x1f2   :  { %1671 = vmatprep.subr.bf16.mxu0 %v1780_v56  ;;  %v2165_v52 = vand.u32 127, %v1177_v51 }
 0x1f3   :  { %1655 = vmatprep.mubr.bf16.mxu0 %v815_v55 }
 0x1f4   :  { %1656 = vmatmul.mubr.bf16.gmra.mrb[28].mxu0 %v816_v54  ;;  %vm1179_vm0 = vcmp.lt.s32.totalorder %v2165_v52, 8 }
 0x1f5   :  { %1672 = vmatpush3.bf16.msra.mxu0 %v1780_v56 }
 0x1f6   :  { %1673 = vmatprep.subr.bf16.mxu0 %v1781_v57 }
 0x1f9   :  { %1674 = vmatpush3.bf16.msra.mxu0 %v1781_v57 }
 0x2af   :  { %v1645_v59 = vpop.f32.mrb[16].mxu0 }
 0x2b0   :  { %v931_v60 = vadd.f32 %v1645_v59, %v1433_v58  ;;  %v922_v61 = vpop.f32.mrb[17].mxu0 }
 0x2b1   :  { %v923_v62 = vadd.f32 %v1433_v58, %v922_v61  ;;  %v1646_v63 = vpop.f32.mrb[18].mxu0 }
 0x2b2   :  { %v934_v0 = vadd.f32 %v1646_v63, %v1433_v58  ;;  %v925_v1 = vpop.f32.mrb[19].mxu0  ;;  %v987_v3 = vmax.f32 %v931_v60, 0.0 }
 0x2b3   :  { %v926_v2 = vadd.f32 %v1433_v58, %v925_v1  ;;  %v985_v5 = vmax.f32 %v923_v62, 0.0 }
 0x2b4   :  { %v988_v4 = vmax.f32 %v934_v0, 0.0 }
 0x2b5   :  { %v986_v6 = vmax.f32 %v926_v2, 0.0 }
 0x2b6   :  { %v1002_v7 = vpack.c.bf16 %v988_v4, %v987_v3 }
 0x2b7   :  { %v1001_v8 = vpack.c.bf16 %v986_v6, %v985_v5  ;;  %v1649_v9 = vpop.f32.mrb[20].mxu0 }
 0x2b8   :  { %v947_v10 = vadd.f32 %v1649_v9, %v1433_v58  ;;  %v938_v11 = vpop.f32.mrb[21].mxu0 }
 0x2b9   :  { %v939_v12 = vadd.f32 %v1433_v58, %v938_v11  ;;  %v1650_v13 = vpop.f32.mrb[22].mxu0  ;;  %1675 = vmatprep.mubr.bf16.mxu0 %v1001_v8 }
 0x2ba   :  { %v950_v14 = vadd.f32 %v1650_v13, %v1433_v58  ;;  %v941_v15 = vpop.f32.mrb[23].mxu0  ;;  %1676 = vmatmul.mubr.bf16.vlgmr.msra.gmra.mrb[32].mxu0 %v1002_v7  ;;  %v991_v17 = vmax.f32 %v947_v10, 0.0 }
 0x2bb   :  { %v942_v16 = vadd.f32 %v1433_v58, %v941_v15  ;;  %v989_v19 = vmax.f32 %v939_v12, 0.0 }
 0x2bc   :  { %v992_v18 = vmax.f32 %v950_v14, 0.0 }
 0x2bd   :  { %v990_v20 = vmax.f32 %v942_v16, 0.0 }
 0x2be   :  { %v1004_v21 = vpack.c.bf16 %v992_v18, %v991_v17 }
 0x2bf   :  { %v1003_v22 = vpack.c.bf16 %v990_v20, %v989_v19  ;;  %v1653_v23 = vpop.f32.mrb[24].mxu0 }
 0x2c0   :  { %v963_v24 = vadd.f32 %v1653_v23, %v1433_v58  ;;  %v954_v25 = vpop.f32.mrb[25].mxu0 }
 0x2c1   :  { %v955_v26 = vadd.f32 %v1433_v58, %v954_v25  ;;  %v1654_v27 = vpop.f32.mrb[26].mxu0  ;;  %1679 = vmatprep.mubr.bf16.mxu0 %v1003_v22 }
 0x2c2   :  { %v966_v28 = vadd.f32 %v1654_v27, %v1433_v58  ;;  %v957_v29 = vpop.f32.mrb[27].mxu0  ;;  %1680 = vmatmul.mubr.bf16.gmra.mrb[36].mxu0 %v1004_v21  ;;  %v995_v31 = vmax.f32 %v963_v24, 0.0 }
 0x2c3   :  { %v958_v30 = vadd.f32 %v1433_v58, %v957_v29  ;;  %v993_v33 = vmax.f32 %v955_v26, 0.0 }
 0x2c4   :  { %v996_v32 = vmax.f32 %v966_v28, 0.0 }
 0x2c5   :  { %v994_v34 = vmax.f32 %v958_v30, 0.0 }
 0x2c6   :  { %v1006_v35 = vpack.c.bf16 %v996_v32, %v995_v31 }
 0x2c7   :  { %v1005_v36 = vpack.c.bf16 %v994_v34, %v993_v33  ;;  %v1657_v37 = vpop.f32.mrb[28].mxu0 }
 0x2c8   :  { %v979_v38 = vadd.f32 %v1657_v37, %v1433_v58  ;;  %v970_v39 = vpop.f32.mrb[29].mxu0 }
 0x2c9   :  { %v971_v40 = vadd.f32 %v1433_v58, %v970_v39  ;;  %v1658_v41 = vpop.f32.mrb[30].mxu0  ;;  %1683 = vmatprep.mubr.bf16.mxu1 %v1005_v36 }
 0x2ca   :  { %v982_v42 = vadd.f32 %v1658_v41, %v1433_v58  ;;  %v973_v43 = vpop.f32.mrb[31].mxu0  ;;  %1684 = vmatmul.mubr.bf16.vlgmr.msra.gmra.mrb[16].mxu1 %v1006_v35  ;;  %v999_v45 = vmax.f32 %v979_v38, 0.0 }
 0x2cb   :  { %v974_v44 = vadd.f32 %v1433_v58, %v973_v43  ;;  %v997_v47 = vmax.f32 %v971_v40, 0.0 }
 0x2cc   :  { %v1000_v46 = vmax.f32 %v982_v42, 0.0 }
 0x2cd   :  { %v998_v48 = vmax.f32 %v974_v44, 0.0 }
 0x2ce   :  { %v1008_v49 = vpack.c.bf16 %v1000_v46, %v999_v45 }
 0x2cf   :  { %v1007_v50 = vpack.c.bf16 %v998_v48, %v997_v47 }
 0x2d1   :  { %1687 = vmatprep.mubr.bf16.mxu1 %v1007_v50 }
 0x2d2   :  { %1688 = vmatmul.mubr.bf16.gmra.mrb[20].mxu1 %v1008_v49 }
 0x38d   :  { %v1677_v54 = vpop.f32.mrb[32].mxu0 }
 0x38e   :  { %v2171_v55 = vadd.f32 %v1677_v54, %v1442_v53  ;;  %v1114_v56 = vpop.f32.mrb[33].mxu0 }
 0x38f   :  { %v1678_v57 = vpop.f32.mrb[34].mxu0  ;;  %v2173_v58 = vadd.f32 %v1442_v53, %v1114_v56 }
 0x390   :  { %v1117_v59 = vpop.f32.mrb[35].mxu0  ;;  %v1182_v60 = vsel %vm1179_vm0, %v2171_v55, -1e+30  ;;  %v2185_v63 = vadd.f32 %v1678_v57, %v1442_v53 }
 0x391   :  { %v2178_v61 = vadd.f32 %v1442_v53, %v1117_v59  ;;  %1200 = vmax.xlane.f32.xlu0 %v1182_v60  ;;  %v1180_v0 = vsel %vm1179_vm0, %v2173_v58, -1e+30 }
 0x392   :  { %v1183_v9 = vsel %vm1179_vm0, %v2185_v63, -1e+30 }
 0x393   :  { %v2183_v62 = vsel %vm1179_vm0, %v2178_v61, -1e+30 }
 0x394   :  { %1198 = vmax.xlane.f32.xlu1 %v2183_v62 }
 0x395   :  { %v1681_v1 = vpop.f32.mrb[36].mxu0  ;;  %1196 = vmax.xlane.f32.xlu0 %v1180_v0 }
 0x396   :  { %v2191_v2 = vadd.f32 %v1681_v1, %v1442_v53  ;;  %v1130_v3 = vpop.f32.mrb[37].mxu0 }
 0x397   :  { %v1682_v4 = vpop.f32.mrb[38].mxu0  ;;  %v2193_v5 = vadd.f32 %v1442_v53, %v1130_v3 }
 0x398   :  { %v2195_v6 = vadd.f32 %v1682_v4, %v1442_v53  ;;  %v1133_v7 = vpop.f32.mrb[39].mxu0  ;;  %v1186_v8 = vsel %vm1179_vm0, %v2191_v2, -1e+30 }
 0x399   :  { %1208 = vmax.xlane.f32.xlu1 %v1186_v8  ;;  %1202 = vmax.xlane.f32.xlu0 %v1183_v9  ;;  %v2203_v10 = vadd.f32 %v1442_v53, %v1133_v7  ;;  %v1184_v11 = vsel %vm1179_vm0, %v2193_v5, -1e+30 }
 0x39a   :  { %v2211_v12 = vsel %vm1179_vm0, %v2195_v6, -1e+30 }
 0x39b   :  { %v2226_v21 = vsel %vm1179_vm0, %v2203_v10, -1e+30 }
 0x39d   :  { %v1685_v13 = vpop.f32.mrb[16].mxu1  ;;  %1204 = vmax.xlane.f32.xlu1 %v1184_v11  ;;  %1210 = vmax.xlane.f32.xlu0 %v2211_v12 }
 0x39e   :  { %v2214_v14 = vadd.f32 %v1685_v13, %v1442_v53  ;;  %v1146_v15 = vpop.f32.mrb[17].mxu1 }
 0x39f   :  { %v1686_v16 = vpop.f32.mrb[18].mxu1  ;;  %v2216_v17 = vadd.f32 %v1442_v53, %v1146_v15 }
 0x3a0   :  { %v2218_v18 = vadd.f32 %v1686_v16, %v1442_v53  ;;  %v1149_v19 = vpop.f32.mrb[19].mxu1  ;;  %v1190_v20 = vsel %vm1179_vm0, %v2214_v14, -1e+30 }
 0x3a1   :  { %1216 = vmax.xlane.f32.xlu1 %v1190_v20  ;;  %1206 = vmax.xlane.f32.xlu0 %v2226_v21  ;;  %v2229_v22 = vadd.f32 %v1442_v53, %v1149_v19  ;;  %v2234_v23 = vsel %vm1179_vm0, %v2216_v17, -1e+30 }
 0x3a2   :  { %v2239_v24 = vsel %vm1179_vm0, %v2218_v18, -1e+30 }
 0x3a3   :  { %v2248_v30 = vsel %vm1179_vm0, %v2229_v22, -1e+30 }
 0x3a5   :  { %1212 = vmax.xlane.f32.xlu1 %v2234_v23  ;;  %1218 = vmax.xlane.f32.xlu0 %v2239_v24  ;;  %v1689_v25 = vpop.f32.mrb[20].mxu1 }
 0x3a6   :  { %v1162_v26 = vpop.f32.mrb[21].mxu1  ;;  %v2250_v31 = vadd.f32 %v1689_v25, %v1442_v53 }
 0x3a7   :  { %v2243_v27 = vadd.f32 %v1442_v53, %v1162_v26  ;;  %v1690_v28 = vpop.f32.mrb[22].mxu1 }
 0x3a8   :  { %v1165_v29 = vpop.f32.mrb[23].mxu1  ;;  %v2266_v35 = vadd.f32 %v1690_v28, %v1442_v53  ;;  %v2272_v36 = vsel %vm1179_vm0, %v2250_v31, -1e+30 }
 0x3a9   :  { %v2252_v32 = vadd.f32 %v1442_v53, %v1165_v29  ;;  %1214 = vmax.xlane.f32.xlu0 %v2248_v30  ;;  %v2258_v33 = vsel %vm1179_vm0, %v2243_v27, -1e+30 }
 0x3aa   :  { %1220 = vmax.xlane.f32.xlu1 %v2258_v33  ;;  %v2278_v37 = vsel %vm1179_vm0, %v2266_v35, -1e+30 }
 0x3ab   :  { %v2264_v34 = vsel %vm1179_vm0, %v2252_v32, -1e+30 }
 0x3ad   :  { %1222 = vmax.xlane.f32.xlu0 %v2264_v34 }
 0x3ae   :  { %1224 = vmax.xlane.f32.xlu1 %v2272_v36 }
 0x3b1   :  { %1226 = vmax.xlane.f32.xlu0 %v2278_v37 }
 0x41e   :  { %v2281_v38 = vpop.xlane.xlu0 %1200 }
 0x41f   :  { %v1230_v39 = vsub.f32 %v1182_v60, %v2281_v38 }
 0x421   :  { %v1248_v40 = vmul.f32 1.442695, %v1230_v39  ;;  %v2284_v41 = vpop.xlane.xlu1 %1198 }
 0x422   :  { %v2286_v42 = vpop.xlane.xlu0 %1196  ;;  %v1229_v49 = vsub.f32 %v2183_v62, %v2284_v41 }
 0x423   :  { %1782 = vpow2.f32 %v1248_v40  ;;  %v1228_v43 = vsub.f32 %v1180_v0, %v2286_v42 }
 0x424   :  { %v1246_v56 = vmul.f32 1.442695, %v1229_v49 }
 0x425   :  { %v1244_v44 = vmul.f32 1.442695, %v1228_v43 }
 0x426   :  { %v2289_v45 = vpop.xlane.xlu1 %1208  ;;  %v2291_v46 = vpop.xlane.xlu0 %1202 }
 0x427   :  { %1784 = vpow2.f32 %v1244_v44  ;;  %v1234_v47 = vsub.f32 %v1186_v8, %v2289_v45  ;;  %v1231_v48 = vsub.f32 %v1183_v9, %v2291_v46 }
 0x429   :  { %v1256_v50 = vmul.f32 1.442695, %v1234_v47  ;;  %v1250_v51 = vmul.f32 1.442695, %v1231_v48 }
 0x42a   :  { %v2297_v52 = vpop.xlane.xlu1 %1204  ;;  %v2299_v53 = vpop.xlane.xlu0 %1210 }
 0x42b   :  { %1786 = vpow2.f32 %v1256_v50  ;;  %v1232_v54 = vsub.f32 %v1184_v11, %v2297_v52  ;;  %v1235_v57 = vsub.f32 %v2211_v12, %v2299_v53 }
 0x42c   :  { %1788 = vpow2.f32 %v1250_v51 }
 0x42d   :  { %v1783_v59 = vpop.eup %1782  ;;  %v1252_v60 = vmul.f32 1.442695, %v1232_v54  ;;  %v1258_v3 = vmul.f32 1.442695, %v1235_v57 }
 0x42e   :  { %v2304_v0 = vpop.xlane.xlu1 %1216  ;;  %v2306_v1 = vpop.xlane.xlu0 %1206  ;;  %1280 = vadd.xlane.f32.xlu1 %v1783_v59 }
 0x42f   :  { %1790 = vpow2.f32 %v1252_v60  ;;  %v1238_v62 = vsub.f32 %v1190_v20, %v2304_v0  ;;  %v1233_v4 = vsub.f32 %v2226_v21, %v2306_v1 }
 0x430   :  { %1792 = vpow2.f32 %v1246_v56 }
 0x431   :  { %v1785_v7 = vpop.eup %1784  ;;  %v1264_v8 = vmul.f32 1.442695, %v1238_v62  ;;  %v1254_v15 = vmul.f32 1.442695, %v1233_v4 }
 0x432   :  { %v2311_v9 = vpop.xlane.xlu1 %1212  ;;  %v2313_v11 = vpop.xlane.xlu0 %1218  ;;  %1276 = vadd.xlane.f32.xlu1 %v1785_v7 }
 0x433   :  { %1794 = vpow2.f32 %v1264_v8  ;;  %v1236_v12 = vsub.f32 %v2234_v23, %v2311_v9  ;;  %v1239_v13 = vsub.f32 %v2239_v24, %v2313_v11 }
 0x434   :  { %1796 = vpow2.f32 %v1258_v3 }
 0x435   :  { %v1787_v16 = vpop.eup %1786  ;;  %v1260_v19 = vmul.f32 1.442695, %v1236_v12  ;;  %v1266_v25 = vmul.f32 1.442695, %v1239_v13 }
 0x436   :  { %v1789_v20 = vpop.eup %1788  ;;  %v2319_v21 = vpop.xlane.xlu0 %1214  ;;  %1288 = vadd.xlane.f32.xlu1 %v1787_v16 }
 0x437   :  { %1798 = vpow2.f32 %v1260_v19  ;;  %v1237_v26 = vsub.f32 %v2248_v30, %v2319_v21  ;;  %1282 = vadd.xlane.f32.xlu0 %v1789_v20  ;;  %v2323_v28 = vpop.xlane.xlu1 %1220 }
 0x438   :  { %1800 = vpow2.f32 %v1254_v15  ;;  %v1240_v23 = vsub.f32 %v2258_v33, %v2323_v28 }
 0x439   :  { %v1791_v24 = vpop.eup %1790  ;;  %1802 = vpow2.f32 %v1266_v25  ;;  %v1262_v43 = vmul.f32 1.442695, %v1237_v26 }
 0x43a   :  { %v1793_v29 = vpop.eup %1792  ;;  %v1268_v39 = vmul.f32 1.442695, %v1240_v23  ;;  %v2327_v40 = vpop.xlane.xlu0 %1222  ;;  %1284 = vadd.xlane.f32.xlu1 %v1791_v24 }
 0x43b   :  { %1278 = vadd.xlane.f32.xlu0 %v1793_v29  ;;  %v2329_v44 = vpop.xlane.xlu1 %1224  ;;  %v1241_v30 = vsub.f32 %v2264_v34, %v2327_v40 }
 0x43c   :  { %1804 = vpow2.f32 %v1268_v39  ;;  %v1242_v47 = vsub.f32 %v2272_v36, %v2329_v44 }
 0x43d   :  { %v1795_v48 = vpop.eup %1794  ;;  %1806 = vpow2.f32 %v1262_v43  ;;  %v1270_v51 = vmul.f32 1.442695, %v1241_v30 }
 0x43e   :  { %v1797_v33 = vpop.eup %1796  ;;  %v1272_v49 = vmul.f32 1.442695, %v1242_v47  ;;  %v2335_v50 = vpop.xlane.xlu0 %1226  ;;  %1296 = vadd.xlane.f32.xlu1 %v1795_v48 }
 0x43f   :  { %1290 = vadd.xlane.f32.xlu0 %v1797_v33  ;;  %v1243_v54 = vsub.f32 %v2278_v37, %v2335_v50 }
 0x440   :  { %1808 = vpow2.f32 %v1272_v49 }
 0x441   :  { %v1799_v56 = vpop.eup %1798  ;;  %1810 = vpow2.f32 %v1270_v51  ;;  %v1274_v34 = vmul.f32 1.442695, %v1243_v54 }
 0x442   :  { %v1801_v57 = vpop.eup %1800  ;;  %1292 = vadd.xlane.f32.xlu1 %v1799_v56 }
 0x443   :  { %1286 = vadd.xlane.f32.xlu0 %v1801_v57  ;;  %v1803_v36 = vpop.eup %1802  ;;  %1812 = vpow2.f32 %v1274_v34 }
 0x446   :  { %v1805_v59 = vpop.eup %1804 }
 0x447   :  { %1298 = vadd.xlane.f32.xlu0 %v1803_v36  ;;  %1300 = vadd.xlane.f32.xlu1 %v1805_v59  ;;  %v1807_v60 = vpop.eup %1806 }
 0x44a   :  { %v1809_v62 = vpop.eup %1808 }
 0x44b   :  { %1294 = vadd.xlane.f32.xlu0 %v1807_v60  ;;  %1304 = vadd.xlane.f32.xlu1 %v1809_v62  ;;  %v1811_v3 = vpop.eup %1810 }
 0x44d   :  { %v1813_v4 = vpop.eup %1812 }
 0x44f   :  { %1302 = vadd.xlane.f32.xlu0 %v1811_v3 }
 0x453   :  { %1306 = vadd.xlane.f32.xlu0 %v1813_v4 }
 0x4bb   :  { %v1281_v37 = vpop.xlane.xlu1 %1280 }
 0x4bc   :  { %1814 = vlog2.f32 %v1281_v37 }
 0x4bf   :  { %v1277_v7 = vpop.xlane.xlu1 %1276 }
 0x4c0   :  { %1816 = vlog2.f32 %v1277_v7 }
 0x4c3   :  { %v1289_v8 = vpop.xlane.xlu1 %1288 }
 0x4c4   :  { %v1283_v12 = vpop.xlane.xlu0 %1282  ;;  %1818 = vlog2.f32 %v1289_v8 }
 0x4c5   :  { %1820 = vlog2.f32 %v1283_v12 }
 0x4c6   :  { %v1815_v13 = vpop.eup %1814 }
 0x4c7   :  { %v1313_v15 = vmul.f32 0.6931472, %v1815_v13  ;;  %v1285_v16 = vpop.xlane.xlu1 %1284 }
 0x4c8   :  { %v1279_v19 = vpop.xlane.xlu0 %1278  ;;  %1822 = vlog2.f32 %v1285_v16 }
 0x4c9   :  { %v1342_v20 = vadd.f32 %v1313_v15, %v2281_v38  ;;  %1824 = vlog2.f32 %v1279_v19 }
 0x4ca   :  { %v1817_v25 = vpop.eup %1816 }
 0x4cb   :  { %v1358_v26 = vsub.f32 %v2171_v55, %v1342_v20  ;;  %v1309_v23 = vmul.f32 0.6931472, %v1817_v25  ;;  %v1297_v24 = vpop.xlane.xlu1 %1296 }
 0x4cc   :  { %v1291_v29 = vpop.xlane.xlu0 %1290  ;;  %1826 = vlog2.f32 %v1297_v24 }
 0x4cd   :  { %1374 = vst [vmem:[%s2430_s11 + $0x10] sm:$0xff] %v1358_v26  ;;  %v1340_v39 = vadd.f32 %v1309_v23, %v2286_v42  ;;  %1828 = vlog2.f32 %v1291_v29 }
 0x4ce   :  { %v1819_v43 = vpop.eup %1818 }
 0x4cf   :  { %v1821_v30 = vpop.eup %1820  ;;  %v1356_v47 = vsub.f32 %v2173_v58, %v1340_v39  ;;  %v1321_v38 = vmul.f32 0.6931472, %v1819_v43  ;;  %v1293_v48 = vpop.xlane.xlu1 %1292 }
 0x4d0   :  { %v1315_v33 = vmul.f32 0.6931472, %v1821_v30  ;;  %v1287_v49 = vpop.xlane.xlu0 %1286  ;;  %1830 = vlog2.f32 %v1293_v48 }
 0x4d1   :  { %1372 = vst [vmem:[%s2430_s11] sm:$0xff] %v1356_v47  ;;  %v1346_v55 = vadd.f32 %v1321_v38, %v2289_v45  ;;  %1832 = vlog2.f32 %v1287_v49 }
 0x4d2   :  { %v1823_v51 = vpop.eup %1822  ;;  %v1343_v42 = vadd.f32 %v1315_v33, %v2291_v46 }
 0x4d3   :  { %v1825_v54 = vpop.eup %1824  ;;  %v1362_v56 = vsub.f32 %v2191_v2, %v1346_v55  ;;  %v1317_v57 = vmul.f32 0.6931472, %v1823_v51 }
 0x4d4   :  { %v1359_v58 = vsub.f32 %v2185_v63, %v1343_v42  ;;  %v1311_v34 = vmul.f32 0.6931472, %v1825_v54  ;;  %v1299_v36 = vpop.xlane.xlu0 %1298  ;;  %v1301_v59 = vpop.xlane.xlu1 %1300 }
 0x4d5   :  { %1378 = vst [vmem:[%s2430_s11 + $0x30] sm:$0xff] %v1362_v56  ;;  %v1344_v60 = vadd.f32 %v1317_v57, %v2297_v52  ;;  %1834 = vlog2.f32 %v1299_v36 }
 0x4d6   :  { %v1827_v45 = vpop.eup %1826  ;;  %1375 = vst [vmem:[%s2430_s11 + $0x18] sm:$0xff] %v1359_v58  ;;  %v1341_v2 = vadd.f32 %v1311_v34, %v2284_v41  ;;  %1836 = vlog2.f32 %v1301_v59 }
 0x4d7   :  { %v1829_v46 = vpop.eup %1828  ;;  %v1360_v63 = vsub.f32 %v2193_v5, %v1344_v60  ;;  %v1329_v62 = vmul.f32 0.6931472, %v1827_v45 }
 0x4d8   :  { %v1357_v3 = vsub.f32 %v2178_v61, %v1341_v2  ;;  %v1323_v4 = vmul.f32 0.6931472, %v1829_v46  ;;  %v1295_v37 = vpop.xlane.xlu0 %1294  ;;  %v1305_v7 = vpop.xlane.xlu1 %1304 }
 0x4d9   :  { %1376 = vst [vmem:[%s2430_s11 + $0x20] sm:$0xff] %v1360_v63  ;;  %v1350_v52 = vadd.f32 %v1329_v62, %v2304_v0  ;;  %1838 = vlog2.f32 %v1295_v37 }
 0x4da   :  { %v1831_v8 = vpop.eup %1830  ;;  %1373 = vst [vmem:[%s2430_s11 + $0x8] sm:$0xff] %v1357_v3  ;;  %v1347_v5 = vadd.f32 %v1323_v4, %v2299_v53  ;;  %1840 = vlog2.f32 %v1305_v7 }
 0x4db   :  { %v1833_v41 = vpop.eup %1832  ;;  %v1366_v61 = vsub.f32 %v2214_v14, %v1350_v52  ;;  %v1325_v12 = vmul.f32 0.6931472, %v1831_v8 }
 0x4dc   :  { %v1363_v13 = vsub.f32 %v2195_v6, %v1347_v5  ;;  %v1319_v15 = vmul.f32 0.6931472, %v1833_v41  ;;  %v1303_v16 = vpop.xlane.xlu0 %1302 }
 0x4dd   :  { %1382 = vst [vmem:[%s2430_s11 + $0x50] sm:$0xff] %v1366_v61  ;;  %v1348_v0 = vadd.f32 %v1325_v12, %v2311_v9  ;;  %1842 = vlog2.f32 %v1303_v16 }
 0x4de   :  { %1379 = vst [vmem:[%s2430_s11 + $0x38] sm:$0xff] %v1363_v13  ;;  %v1345_v53 = vadd.f32 %v1319_v15, %v2306_v1 }
 0x4df   :  { %v1835_v19 = vpop.eup %1834  ;;  %v1364_v14 = vsub.f32 %v2216_v17, %v1348_v0 }
 0x4e0   :  { %v1837_v20 = vpop.eup %1836  ;;  %v1361_v6 = vsub.f32 %v2203_v10, %v1345_v53  ;;  %v1331_v25 = vmul.f32 0.6931472, %v1835_v19  ;;  %v1307_v26 = vpop.xlane.xlu0 %1306 }
 0x4e1   :  { %1380 = vst [vmem:[%s2430_s11 + $0x40] sm:$0xff] %v1364_v14  ;;  %v1333_v9 = vmul.f32 0.6931472, %v1837_v20  ;;  %1844 = vlog2.f32 %v1307_v26 }
 0x4e2   :  { %1377 = vst [vmem:[%s2430_s11 + $0x28] sm:$0xff] %v1361_v6  ;;  %v1351_v1 = vadd.f32 %v1331_v25, %v2313_v11 }
 0x4e3   :  { %v1839_v23 = vpop.eup %1838  ;;  %v1352_v17 = vadd.f32 %v1333_v9, %v2323_v28 }
 0x4e4   :  { %v1841_v24 = vpop.eup %1840  ;;  %v1367_v10 = vsub.f32 %v2218_v18, %v1351_v1  ;;  %v1327_v29 = vmul.f32 0.6931472, %v1839_v23 }
 0x4e5   :  { %v1368_v39 = vsub.f32 %v2243_v27, %v1352_v17  ;;  %v1337_v43 = vmul.f32 0.6931472, %v1841_v24 }
 0x4e6   :  { %1383 = vst [vmem:[%s2430_s11 + $0x58] sm:$0xff] %v1367_v10  ;;  %v1349_v30 = vadd.f32 %v1327_v29, %v2319_v21 }
 0x4e7   :  { %v1843_v47 = vpop.eup %1842  ;;  %1384 = vst [vmem:[%s2430_s11 + $0x60] sm:$0xff] %v1368_v39  ;;  %v1354_v11 = vadd.f32 %v1337_v43, %v2329_v44 }
 0x4e8   :  { %v1365_v28 = vsub.f32 %v2229_v22, %v1349_v30  ;;  %v1335_v18 = vmul.f32 0.6931472, %v1843_v47 }
 0x4e9   :  { %v1370_v38 = vsub.f32 %v2250_v31, %v1354_v11 }
 0x4ea   :  { %1381 = vst [vmem:[%s2430_s11 + $0x48] sm:$0xff] %v1365_v28  ;;  %v1353_v27 = vadd.f32 %v1335_v18, %v2327_v40 }
 0x4eb   :  { %v1845_v48 = vpop.eup %1844  ;;  %1386 = vst [vmem:[%s2430_s11 + $0x70] sm:$0xff] %v1370_v38 }
 0x4ec   :  { %v1369_v21 = vsub.f32 %v2252_v32, %v1353_v27  ;;  %v1339_v33 = vmul.f32 0.6931472, %v1845_v48 }
 0x4ee   :  { %1385 = vst [vmem:[%s2430_s11 + $0x68] sm:$0xff] %v1369_v21  ;;  %v1355_v22 = vadd.f32 %v1339_v33, %v2335_v50 }
 0x4f0   :  { %v1371_v31 = vsub.f32 %v2266_v35, %v1355_v22 }
 0x4f2   :  { %1387 = vst [vmem:[%s2430_s11 + $0x78] sm:$0xff] %v1371_v31 }

</bundles_post_ra>
